<compile_context>
chip_gen: v6e
topology: v6e:2x2x1
jax: 0.10.0
libtpu: 0.0.40
codegen_flags: <defaults>
</compile_context>

<pallas_src>
import jax
import jax.numpy as jnp
from jax.experimental import pallas as pl
from jax.experimental.pallas import tpu as pltpu


# ----------------------------------------------------------------------------
# Fixed synthetic architecture (encoder/projector/decoder are ctor args in the
# PyTorch module; these match the reference implementation below).
# ----------------------------------------------------------------------------
C_IN = 4                       # gelslim input channels
H_IN = W_IN = 16
S_IN = H_IN * W_IN             # 256 input pixels
E1 = E2 = 8                    # encoder channels
S_POOL = (H_IN // 2) * (W_IN // 2)   # 64 pooled pixels
PROJ_H = 32
D, H_LOW, W_LOW = 8, 4, 4      # encoded_shape
S_LOW = H_LOW * W_LOW          # 16 decoder-input pixels
D1, D2, C_OUT = 16, 8, 3
OUT_COLS = C_OUT * S_IN        # 768 = lane-dense output row per image

# Packed-slab layouts (single DMA per slab instead of 16 tiny inputs).
ENC_ROWS, ENC_COLS = 48, 128   # encoder + projector weights/biases (f32)
DEC_ROWS, DEC_COLS = 520, 256  # decoder block matrices + biases (f32)


# ----------------------------------------------------------------------------
# Fused kernel (one grid step == one block of B images)
# ----------------------------------------------------------------------------
def _conv1x1_mac(w, b, x):
    """1x1 conv over the channel dim of a (B, C_in, S) activation slab.

    w: (C_out, C_in), b: (C_out, 1), x: (B, C_in, S) -> (B, C_out, S).
    Unrolled VPU MAC over the tiny C_in (<=8): each step lane-broadcasts one
    weight column against a (B, 1, S) slice — no MXU, no cross-lane traffic."""
    c_in = w.shape[1]
    acc = w[:, 0:1] * x[:, 0:1, :]
    for c in range(1, c_in):
        acc = acc + w[:, c:c + 1] * x[:, c:c + 1, :]
    return acc + b


def _fused_simclr_kernel(x_ref, encw_ref, pmat_ref, decw_ref, umat_ref, out_ref):
    f32, bf16 = jnp.float32, jnp.bfloat16
    blk_b = x_ref.shape[0]

    # ---- unpack small-weight slab (static slices) ---------------------------
    we1 = encw_ref[0:E1, 0:C_IN]                    # (8, 4)
    be1 = encw_ref[0:E1, 4:5]                       # (8, 1)
    we2 = encw_ref[0:E2, 8:8 + E1]                  # (8, 8)
    be2 = encw_ref[0:E2, 16:17]                     # (8, 1)
    w1 = encw_ref[0:E2, 32:32 + PROJ_H]             # (8, 32)
    b1 = encw_ref[8:9, 32:32 + PROJ_H]              # (1, 32)
    b2 = encw_ref[9:10, 0:D * S_LOW]                # (1, 128)
    w2 = encw_ref[16:16 + PROJ_H, 0:D * S_LOW]      # (32, 128)

    m1 = decw_ref[0:D * S_LOW, 0:D1 * S_LOW]        # (128, 256) dec conv1 block mat
    m2 = decw_ref[128:128 + D1 * S_LOW, 0:D2 * S_LOW]   # (256, 128) dec conv2
    m3 = decw_ref[384:384 + D2 * S_LOW, 0:C_OUT * S_LOW]  # (128, 48) dec conv3
    b1r = decw_ref[512:513, 0:D1 * S_LOW]           # (1, 256)
    b2r = decw_ref[513:514, 0:D2 * S_LOW]           # (1, 128)
    b3r = decw_ref[514:515, 0:C_OUT * S_LOW]        # (1, 48)

    # ---- encoder (frozen in PyTorch; forward math identical) ----------------
    x = x_ref[...]                                               # (B, 4, 256)
    h = jnp.maximum(_conv1x1_mac(we1, be1, x), 0.0)              # (B, 8, 256)

    # 2x2 avg-pool as ONE tall-LHS bf16 MXU matmul: (B*8, 256) @ (256, 64).
    # pmat is {0, 0.25} so bf16 is exact on the constant side.
    hp = jnp.dot(h.reshape(blk_b * E1, S_IN).astype(bf16), pmat_ref[...],
                 preferred_element_type=f32).reshape(blk_b, E1, S_POOL)

    h2 = jnp.maximum(_conv1x1_mac(we2, be2, hp), 0.0)            # (B, 8, 64)
    lat = jnp.sum(h2, axis=-1) * (1.0 / S_POOL)                  # (B, 8) global avg

    # ---- projector: two MXU dots (replaces the 32-step broadcast loop) ------
    p1 = jnp.maximum(jnp.dot(lat, w1, preferred_element_type=f32) + b1, 0.0)  # (B,32)
    proj = jnp.dot(p1, w2, preferred_element_type=f32) + b2       # (B,128), col = d*16+s
    # column ordering matches .view(-1, D, H, W): d = col // 16, (h,w) = col % 16

    # ---- decoder, entirely at 4x4 (nearest-upsample commutes with 1x1+act) --
    # Activations stay in a lane-dense (B, C*16) interleaved layout; every 1x1
    # conv is an MXU matmul with a block-structured matrix built on the host.
    y = jnp.maximum(jnp.dot(proj, m1, preferred_element_type=f32) + b1r, 0.0)  # (B, 256)
    y = jnp.maximum(jnp.dot(y, m2, preferred_element_type=f32) + b2r, 0.0)     # (B, 128)
    y = jnp.tanh(jnp.dot(y, m3, preferred_element_type=f32) + b3r)             # (B, 48)

    # Single nearest x4 replication 4x4 -> 16x16 as a {0,1} bf16 MXU matmul.
    # Result (B, 768) is a fully lane/sublane-dense unmasked store.
    out_ref[...] = jnp.dot(y.astype(bf16), umat_ref[...],
                           preferred_element_type=f32).astype(out_ref.dtype)


# ----------------------------------------------------------------------------
# Wrapper
# ----------------------------------------------------------------------------
def _pick_block_b(n):
    """Images per grid step.  Amortize ~0.35us/step overhead and fill the MXU
    (pool matmul M = 8*B), while keeping >=2 grid steps when the batch allows
    so both v7x TensorCores get work.  VMEM is never the constraint here."""
    for cand in (32, 16, 8):
        if n >= 2 * cand:
            return cand
    return 8


def simclr_style_transfer_forward(kparams, x_nchw, block_b=None):
    """Fused SimCLR_Style_Transfer.forward: NCHW gelslim in -> NCHW bubbles out."""
    n, c_in, h, w = x_nchw.shape
    assert (c_in, h, w) == (C_IN, H_IN, W_IN)
    if block_b is None:
        block_b = _pick_block_b(n)
    hw = h * w
    x3 = x_nchw.reshape(n, c_in, hw)                 # NCHW -> (N, C, S): free reshape
    n_pad = -(-n // block_b) * block_b
    if n_pad != n:
        x3 = jnp.concatenate(
            [x3, jnp.zeros((n_pad - n, c_in, hw), x3.dtype)], axis=0)

    encw, pmat, decw, umat = (kparams["encw"], kparams["pmat"],
                              kparams["decw"], kparams["umat"])

    out = pl.pallas_call(
        _fused_simclr_kernel,
        out_shape=jax.ShapeDtypeStruct((n_pad, OUT_COLS), jnp.float32),
        grid=(n_pad // block_b,),
        in_specs=[
            pl.BlockSpec((block_b, c_in, hw), lambda i: (i, 0, 0)),
            pl.BlockSpec(encw.shape, lambda i: (0, 0)),
            pl.BlockSpec(pmat.shape, lambda i: (0, 0)),
            pl.BlockSpec(decw.shape, lambda i: (0, 0)),
            pl.BlockSpec(umat.shape, lambda i: (0, 0)),
        ],
        out_specs=pl.BlockSpec((block_b, OUT_COLS), lambda i: (i, 0)),
        compiler_params=pltpu.CompilerParams(
            dimension_semantics=("parallel",)),
    )(x3, encw, pmat, decw, umat)

    # out row layout is [c*256 + (h*16+w)] so this reshape is exact and free.
    return out[:n].reshape(n, C_OUT, h, w)


# ----------------------------------------------------------------------------
# Parameters (deterministic synthetic init, PyTorch-style uniform(+-1/sqrt(fan_in)))
# ----------------------------------------------------------------------------
def init_linear(key, k_in, k_out):
    wkey, bkey = jax.random.split(key)
    scale = 1.0 / float(k_in) ** 0.5
    w = jax.random.uniform(wkey, (k_in, k_out), jnp.float32, -scale, scale)
    b = jax.random.uniform(bkey, (k_out,), jnp.float32, -scale, scale)
    return w, b


def init_params(key):
    keys = jax.random.split(key, 7)
    params = {
        "enc_conv1": init_linear(keys[0], C_IN, E1),
        "enc_conv2": init_linear(keys[1], E1, E2),
        "proj_fc1": init_linear(keys[2], E2, PROJ_H),
        "proj_fc2": init_linear(keys[3], PROJ_H, D * S_LOW),
        "dec_conv1": init_linear(keys[4], D, D1),
        "dec_conv2": init_linear(keys[5], D1, D2),
        "dec_conv3": init_linear(keys[6], D2, C_OUT),
    }
    return params, (D, H_LOW, W_LOW)


def _block_conv_matrix(w_io, s):
    """Lift a 1x1-conv weight (C_in, C_out) into the (C_in*s, C_out*s) block
    matrix acting on (B, C*s) lane-interleaved activations (col = c*s + pix)."""
    eye = jnp.eye(s, dtype=jnp.float32)
    ci, co = w_io.shape
    return jnp.einsum("do,st->dsot", w_io, eye).reshape(ci * s, co * s)


def prepare_kernel_params(params):
    """Re-layout / pack weights for the fused kernel + derived constant matrices."""
    # ---- small encoder/projector weights packed into one (48, 128) slab -----
    we1, be1 = params["enc_conv1"]          # (4,8), (8,)
    we2, be2 = params["enc_conv2"]          # (8,8), (8,)
    w1, b1 = params["proj_fc1"]             # (8,32), (32,)
    w2, b2 = params["proj_fc2"]             # (32,128), (128,)
    encw = jnp.zeros((ENC_ROWS, ENC_COLS), jnp.float32)
    encw = encw.at[0:E1, 0:C_IN].set(we1.T)
    encw = encw.at[0:E1, 4:5].set(be1.reshape(E1, 1))
    encw = encw.at[0:E2, 8:8 + E1].set(we2.T)
    encw = encw.at[0:E2, 16:17].set(be2.reshape(E2, 1))
    encw = encw.at[0:E2, 32:32 + PROJ_H].set(w1)
    encw = encw.at[8, 32:32 + PROJ_H].set(b1)
    encw = encw.at[9, 0:D * S_LOW].set(b2)
    encw = encw.at[16:16 + PROJ_H, 0:D * S_LOW].set(w2)

    # ---- decoder block matrices + replicated biases in one (520, 256) slab --
    wd1, bd1 = params["dec_conv1"]          # (8,16), (16,)
    wd2, bd2 = params["dec_conv2"]          # (16,8), (8,)
    wd3, bd3 = params["dec_conv3"]          # (8,3),  (3,)
    m1 = _block_conv_matrix(wd1, S_LOW)     # (128, 256)
    m2 = _block_conv_matrix(wd2, S_LOW)     # (256, 128)
    m3 = _block_conv_matrix(wd3, S_LOW)     # (128, 48)
    decw = jnp.zeros((DEC_ROWS, DEC_COLS), jnp.float32)
    decw = decw.at[0:D * S_LOW, 0:D1 * S_LOW].set(m1)
    decw = decw.at[128:128 + D1 * S_LOW, 0:D2 * S_LOW].set(m2)
    decw = decw.at[384:384 + D2 * S_LOW, 0:C_OUT * S_LOW].set(m3)
    decw = decw.at[512, 0:D1 * S_LOW].set(jnp.repeat(bd1, S_LOW))
    decw = decw.at[513, 0:D2 * S_LOW].set(jnp.repeat(bd2, S_LOW))
    decw = decw.at[514, 0:C_OUT * S_LOW].set(jnp.repeat(bd3, S_LOW))

    # ---- 2x2 average pool as a (256, 64) {0, 0.25} matrix (exact in bf16) ---
    r = jnp.arange(S_IN) // W_IN
    c = jnp.arange(S_IN) % W_IN
    pooled_idx = (r // 2) * (W_IN // 2) + (c // 2)
    pmat = (pooled_idx[:, None] ==
            jnp.arange(S_POOL)[None, :]).astype(jnp.float32) * 0.25

    # ---- nearest x4 replication 4x4 -> 16x16 as a (48, 768) {0,1} matrix ----
    h16 = jnp.arange(S_IN) // W_IN
    w16 = jnp.arange(S_IN) % W_IN
    src = (h16 // 4) * W_LOW + (w16 // 4)                               # (256,)
    rep = (jnp.arange(S_LOW)[:, None] == src[None, :]).astype(jnp.float32)
    umat = jnp.einsum("cd,st->csdt",
                      jnp.eye(C_OUT, dtype=jnp.float32), rep
                      ).reshape(C_OUT * S_LOW, OUT_COLS)                # (48, 768)

    return {"encw": encw,
            "pmat": pmat.astype(jnp.bfloat16),
            "decw": decw,
            "umat": umat.astype(jnp.bfloat16)}


# ----------------------------------------------------------------------------
# Pure-JAX reference (original op ordering: pool / upsample at full resolution)
# ----------------------------------------------------------------------------
def _reference_forward(params, encoded_shape, x_nchw):
    hi = jax.lax.Precision.HIGHEST
    d_, he, we = encoded_shape

    def pconv(t, wb, act):
        wgt, b = wb
        y = jnp.einsum("nhwc,co->nhwo", t, wgt, precision=hi) + b
        if act == "relu":
            y = jnp.maximum(y, 0.0)
        elif act == "tanh":
            y = jnp.tanh(y)
        return y

    x = jnp.transpose(x_nchw, (0, 2, 3, 1))                       # NHWC
    h = pconv(x, params["enc_conv1"], "relu")
    n, hh, ww, c = h.shape
    h = h.reshape(n, hh // 2, 2, ww // 2, 2, c).mean(axis=(2, 4))
    h = pconv(h, params["enc_conv2"], "relu")
    latent = h.mean(axis=(1, 2))                                  # (N, 8)

    w1, b1 = params["proj_fc1"]
    w2, b2 = params["proj_fc2"]
    p = jnp.maximum(jnp.dot(latent, w1, precision=hi) + b1, 0.0)
    p = jnp.dot(p, w2, precision=hi) + b2
    proj = p.reshape(-1, d_, he, we)                              # .view(-1, D, H, W)

    t = jnp.transpose(proj, (0, 2, 3, 1))
    t = pconv(t, params["dec_conv1"], "relu")
    t = jnp.repeat(jnp.repeat(t, 2, axis=1), 2, axis=2)
    t = pconv(t, params["dec_conv2"], "relu")
    t = jnp.repeat(jnp.repeat(t, 2, axis=1), 2, axis=2)
    t = pconv(t, params["dec_conv3"], "tanh")
    return jnp.transpose(t, (0, 3, 1, 2))                         # NCHW


if __name__ == "__main__":
    key = jax.random.PRNGKey(0)
    pkey, xkey = jax.random.split(key)
    params, encoded_shape = init_params(pkey)
    kparams = prepare_kernel_params(params)

    x = jax.random.normal(xkey, (2, 4, 16, 16), dtype=jnp.float32)  # NCHW gelslim input

    fwd = jax.jit(simclr_style_transfer_forward)
    out = jax.block_until_ready(fwd(kparams, x))
    assert out.shape == (2, 3, 16, 16), out.shape
    assert bool(jnp.all(jnp.isfinite(out)))

    ref = _reference_forward(params, encoded_shape, x)
    max_err = float(jnp.max(jnp.abs(out - ref)))
    assert max_err < 2e-2, f"mismatch vs pure-JAX reference: {max_err}"
    print("KERNEL_OK")
</pallas_src>

<mosaic_0001>
module attributes {stable_mosaic.version = 11 : i64} {
  func.func @_fused_simclr_kernel(%arg0: i32, %arg1: memref<8x4x256xf32, #tpu.memory_space<vmem>>, %arg2: memref<48x128xf32, #tpu.memory_space<vmem>>, %arg3: memref<256x64xbf16, #tpu.memory_space<vmem>>, %arg4: memref<520x256xf32, #tpu.memory_space<vmem>>, %arg5: memref<48x768xbf16, #tpu.memory_space<vmem>>, %arg6: memref<8x768xf32, #tpu.memory_space<vmem>>) attributes {dimension_semantics = [#tpu.dimension_semantics<parallel>], iteration_bounds = array<i64: 1>, scalar_prefetch = 0 : i64, scratch_operands = 0 : i64, tpu.core_type = #tpu.core_type<tc>, window_params = [{transform_indices = @transform_0, window_bounds = array<i64: 8, 4, 256>}, {pipeline_mode = #tpu.pipeline_mode<synchronous>, transform_indices = @transform_1, window_bounds = array<i64: 48, 128>}, {pipeline_mode = #tpu.pipeline_mode<synchronous>, transform_indices = @transform_2, window_bounds = array<i64: 256, 64>}, {pipeline_mode = #tpu.pipeline_mode<synchronous>, transform_indices = @transform_3, window_bounds = array<i64: 520, 256>}, {pipeline_mode = #tpu.pipeline_mode<synchronous>, transform_indices = @transform_4, window_bounds = array<i64: 48, 768>}, {transform_indices = @transform_5, window_bounds = array<i64: 8, 768>}]} {
    %c0 = arith.constant 0 : index
    %c0_0 = arith.constant 0 : index
    %0 = vector.load %arg2[%c0, %c0_0] : memref<48x128xf32, #tpu.memory_space<vmem>>, vector<8x4xf32>
    %c0_1 = arith.constant 0 : index
    %c4 = arith.constant 4 : index
    %1 = vector.load %arg2[%c0_1, %c4] : memref<48x128xf32, #tpu.memory_space<vmem>>, vector<8x1xf32>
    %c0_2 = arith.constant 0 : index
    %c8 = arith.constant 8 : index
    %2 = vector.load %arg2[%c0_2, %c8] : memref<48x128xf32, #tpu.memory_space<vmem>>, vector<8x8xf32>
    %c0_3 = arith.constant 0 : index
    %c16 = arith.constant 16 : index
    %3 = vector.load %arg2[%c0_3, %c16] : memref<48x128xf32, #tpu.memory_space<vmem>>, vector<8x1xf32>
    %c0_4 = arith.constant 0 : index
    %c32 = arith.constant 32 : index
    %4 = vector.load %arg2[%c0_4, %c32] : memref<48x128xf32, #tpu.memory_space<vmem>>, vector<8x32xf32>
    %c8_5 = arith.constant 8 : index
    %c32_6 = arith.constant 32 : index
    %5 = vector.load %arg2[%c8_5, %c32_6] : memref<48x128xf32, #tpu.memory_space<vmem>>, vector<1x32xf32>
    %c9 = arith.constant 9 : index
    %c0_7 = arith.constant 0 : index
    %6 = vector.load %arg2[%c9, %c0_7] : memref<48x128xf32, #tpu.memory_space<vmem>>, vector<1x128xf32>
    %c16_8 = arith.constant 16 : index
    %c0_9 = arith.constant 0 : index
    %7 = vector.load %arg2[%c16_8, %c0_9] : memref<48x128xf32, #tpu.memory_space<vmem>>, vector<32x128xf32>
    %c0_10 = arith.constant 0 : index
    %c0_11 = arith.constant 0 : index
    %8 = vector.load %arg4[%c0_10, %c0_11] : memref<520x256xf32, #tpu.memory_space<vmem>>, vector<128x256xf32>
    %c128 = arith.constant 128 : index
    %c0_12 = arith.constant 0 : index
    %9 = vector.load %arg4[%c128, %c0_12] : memref<520x256xf32, #tpu.memory_space<vmem>>, vector<256x128xf32>
    %c384 = arith.constant 384 : index
    %c0_13 = arith.constant 0 : index
    %10 = vector.load %arg4[%c384, %c0_13] : memref<520x256xf32, #tpu.memory_space<vmem>>, vector<128x48xf32>
    %c512 = arith.constant 512 : index
    %c0_14 = arith.constant 0 : index
    %11 = vector.load %arg4[%c512, %c0_14] : memref<520x256xf32, #tpu.memory_space<vmem>>, vector<1x256xf32>
    %c513 = arith.constant 513 : index
    %c0_15 = arith.constant 0 : index
    %12 = vector.load %arg4[%c513, %c0_15] : memref<520x256xf32, #tpu.memory_space<vmem>>, vector<1x128xf32>
    %c514 = arith.constant 514 : index
    %c0_16 = arith.constant 0 : index
    %13 = vector.load %arg4[%c514, %c0_16] : memref<520x256xf32, #tpu.memory_space<vmem>>, vector<1x48xf32>
    %c0_17 = arith.constant 0 : index
    %c0_18 = arith.constant 0 : index
    %c0_19 = arith.constant 0 : index
    %14 = vector.load %arg1[%c0_17, %c0_18, %c0_19] : memref<8x4x256xf32, #tpu.memory_space<vmem>>, vector<8x4x256xf32>
    %15 = vector.extract_strided_slice %0 {offsets = [0, 0], sizes = [8, 1], strides = [1, 1]} : vector<8x4xf32> to vector<8x1xf32>
    %16 = vector.extract_strided_slice %14 {offsets = [0, 0, 0], sizes = [8, 1, 256], strides = [1, 1, 1]} : vector<8x4x256xf32> to vector<8x1x256xf32>
    %17 = vector.shape_cast %15 : vector<8x1xf32> to vector<1x8x1xf32>
    %18 = vector.broadcast %17 : vector<1x8x1xf32> to vector<8x8x256xf32>
    %19 = vector.broadcast %16 : vector<8x1x256xf32> to vector<8x8x256xf32>
    %20 = arith.mulf %18, %19 : vector<8x8x256xf32>
    %21 = vector.extract_strided_slice %0 {offsets = [0, 1], sizes = [8, 1], strides = [1, 1]} : vector<8x4xf32> to vector<8x1xf32>
    %22 = vector.extract_strided_slice %14 {offsets = [0, 1, 0], sizes = [8, 1, 256], strides = [1, 1, 1]} : vector<8x4x256xf32> to vector<8x1x256xf32>
    %23 = vector.shape_cast %21 : vector<8x1xf32> to vector<1x8x1xf32>
    %24 = vector.broadcast %23 : vector<1x8x1xf32> to vector<8x8x256xf32>
    %25 = vector.broadcast %22 : vector<8x1x256xf32> to vector<8x8x256xf32>
    %26 = arith.mulf %24, %25 : vector<8x8x256xf32>
    %27 = arith.addf %20, %26 : vector<8x8x256xf32>
    %28 = vector.extract_strided_slice %0 {offsets = [0, 2], sizes = [8, 1], strides = [1, 1]} : vector<8x4xf32> to vector<8x1xf32>
    %29 = vector.extract_strided_slice %14 {offsets = [0, 2, 0], sizes = [8, 1, 256], strides = [1, 1, 1]} : vector<8x4x256xf32> to vector<8x1x256xf32>
    %30 = vector.shape_cast %28 : vector<8x1xf32> to vector<1x8x1xf32>
    %31 = vector.broadcast %30 : vector<1x8x1xf32> to vector<8x8x256xf32>
    %32 = vector.broadcast %29 : vector<8x1x256xf32> to vector<8x8x256xf32>
    %33 = arith.mulf %31, %32 : vector<8x8x256xf32>
    %34 = arith.addf %27, %33 : vector<8x8x256xf32>
    %35 = vector.extract_strided_slice %0 {offsets = [0, 3], sizes = [8, 1], strides = [1, 1]} : vector<8x4xf32> to vector<8x1xf32>
    %36 = vector.extract_strided_slice %14 {offsets = [0, 3, 0], sizes = [8, 1, 256], strides = [1, 1, 1]} : vector<8x4x256xf32> to vector<8x1x256xf32>
    %37 = vector.shape_cast %35 : vector<8x1xf32> to vector<1x8x1xf32>
    %38 = vector.broadcast %37 : vector<1x8x1xf32> to vector<8x8x256xf32>
    %39 = vector.broadcast %36 : vector<8x1x256xf32> to vector<8x8x256xf32>
    %40 = arith.mulf %38, %39 : vector<8x8x256xf32>
    %41 = arith.addf %34, %40 : vector<8x8x256xf32>
    %42 = vector.shape_cast %1 : vector<8x1xf32> to vector<1x8x1xf32>
    %43 = vector.broadcast %42 : vector<1x8x1xf32> to vector<8x8x256xf32>
    %44 = arith.addf %41, %43 : vector<8x8x256xf32>
    %cst = arith.constant 0.000000e+00 : f32
    %45 = vector.broadcast %cst : f32 to vector<8x8x256xf32>
    %46 = arith.maximumf %44, %45 : vector<8x8x256xf32>
    %47 = vector.shape_cast %46 : vector<8x8x256xf32> to vector<64x256xf32>
    %48 = arith.truncf %47 : vector<64x256xf32> to vector<64x256xbf16>
    %c0_20 = arith.constant 0 : index
    %c0_21 = arith.constant 0 : index
    %49 = vector.load %arg3[%c0_20, %c0_21] : memref<256x64xbf16, #tpu.memory_space<vmem>>, vector<256x64xbf16>
    %cst_22 = arith.constant dense<0.000000e+00> : vector<64x64xf32>
    %50 = tpu.matmul %48, %49, %cst_22 {dimension_numbers = #tpu.dot_dimension_numbers<[1], [0], [0], [1], [0, 0, 1, 1], [], []>} : vector<64x256xbf16>, vector<256x64xbf16>, vector<64x64xf32> -> vector<64x64xf32>
    %51 = vector.shape_cast %50 : vector<64x64xf32> to vector<8x8x64xf32>
    %52 = vector.extract_strided_slice %2 {offsets = [0, 0], sizes = [8, 1], strides = [1, 1]} : vector<8x8xf32> to vector<8x1xf32>
    %53 = vector.extract_strided_slice %51 {offsets = [0, 0, 0], sizes = [8, 1, 64], strides = [1, 1, 1]} : vector<8x8x64xf32> to vector<8x1x64xf32>
    %54 = vector.shape_cast %52 : vector<8x1xf32> to vector<1x8x1xf32>
    %55 = vector.broadcast %54 : vector<1x8x1xf32> to vector<8x8x64xf32>
    %56 = vector.broadcast %53 : vector<8x1x64xf32> to vector<8x8x64xf32>
    %57 = arith.mulf %55, %56 : vector<8x8x64xf32>
    %58 = vector.extract_strided_slice %2 {offsets = [0, 1], sizes = [8, 1], strides = [1, 1]} : vector<8x8xf32> to vector<8x1xf32>
    %59 = vector.extract_strided_slice %51 {offsets = [0, 1, 0], sizes = [8, 1, 64], strides = [1, 1, 1]} : vector<8x8x64xf32> to vector<8x1x64xf32>
    %60 = vector.shape_cast %58 : vector<8x1xf32> to vector<1x8x1xf32>
    %61 = vector.broadcast %60 : vector<1x8x1xf32> to vector<8x8x64xf32>
    %62 = vector.broadcast %59 : vector<8x1x64xf32> to vector<8x8x64xf32>
    %63 = arith.mulf %61, %62 : vector<8x8x64xf32>
    %64 = arith.addf %57, %63 : vector<8x8x64xf32>
    %65 = vector.extract_strided_slice %2 {offsets = [0, 2], sizes = [8, 1], strides = [1, 1]} : vector<8x8xf32> to vector<8x1xf32>
    %66 = vector.extract_strided_slice %51 {offsets = [0, 2, 0], sizes = [8, 1, 64], strides = [1, 1, 1]} : vector<8x8x64xf32> to vector<8x1x64xf32>
    %67 = vector.shape_cast %65 : vector<8x1xf32> to vector<1x8x1xf32>
    %68 = vector.broadcast %67 : vector<1x8x1xf32> to vector<8x8x64xf32>
    %69 = vector.broadcast %66 : vector<8x1x64xf32> to vector<8x8x64xf32>
    %70 = arith.mulf %68, %69 : vector<8x8x64xf32>
    %71 = arith.addf %64, %70 : vector<8x8x64xf32>
    %72 = vector.extract_strided_slice %2 {offsets = [0, 3], sizes = [8, 1], strides = [1, 1]} : vector<8x8xf32> to vector<8x1xf32>
    %73 = vector.extract_strided_slice %51 {offsets = [0, 3, 0], sizes = [8, 1, 64], strides = [1, 1, 1]} : vector<8x8x64xf32> to vector<8x1x64xf32>
    %74 = vector.shape_cast %72 : vector<8x1xf32> to vector<1x8x1xf32>
    %75 = vector.broadcast %74 : vector<1x8x1xf32> to vector<8x8x64xf32>
    %76 = vector.broadcast %73 : vector<8x1x64xf32> to vector<8x8x64xf32>
    %77 = arith.mulf %75, %76 : vector<8x8x64xf32>
    %78 = arith.addf %71, %77 : vector<8x8x64xf32>
    %79 = vector.extract_strided_slice %2 {offsets = [0, 4], sizes = [8, 1], strides = [1, 1]} : vector<8x8xf32> to vector<8x1xf32>
    %80 = vector.extract_strided_slice %51 {offsets = [0, 4, 0], sizes = [8, 1, 64], strides = [1, 1, 1]} : vector<8x8x64xf32> to vector<8x1x64xf32>
    %81 = vector.shape_cast %79 : vector<8x1xf32> to vector<1x8x1xf32>
    %82 = vector.broadcast %81 : vector<1x8x1xf32> to vector<8x8x64xf32>
    %83 = vector.broadcast %80 : vector<8x1x64xf32> to vector<8x8x64xf32>
    %84 = arith.mulf %82, %83 : vector<8x8x64xf32>
    %85 = arith.addf %78, %84 : vector<8x8x64xf32>
    %86 = vector.extract_strided_slice %2 {offsets = [0, 5], sizes = [8, 1], strides = [1, 1]} : vector<8x8xf32> to vector<8x1xf32>
    %87 = vector.extract_strided_slice %51 {offsets = [0, 5, 0], sizes = [8, 1, 64], strides = [1, 1, 1]} : vector<8x8x64xf32> to vector<8x1x64xf32>
    %88 = vector.shape_cast %86 : vector<8x1xf32> to vector<1x8x1xf32>
    %89 = vector.broadcast %88 : vector<1x8x1xf32> to vector<8x8x64xf32>
    %90 = vector.broadcast %87 : vector<8x1x64xf32> to vector<8x8x64xf32>
    %91 = arith.mulf %89, %90 : vector<8x8x64xf32>
    %92 = arith.addf %85, %91 : vector<8x8x64xf32>
    %93 = vector.extract_strided_slice %2 {offsets = [0, 6], sizes = [8, 1], strides = [1, 1]} : vector<8x8xf32> to vector<8x1xf32>
    %94 = vector.extract_strided_slice %51 {offsets = [0, 6, 0], sizes = [8, 1, 64], strides = [1, 1, 1]} : vector<8x8x64xf32> to vector<8x1x64xf32>
    %95 = vector.shape_cast %93 : vector<8x1xf32> to vector<1x8x1xf32>
    %96 = vector.broadcast %95 : vector<1x8x1xf32> to vector<8x8x64xf32>
    %97 = vector.broadcast %94 : vector<8x1x64xf32> to vector<8x8x64xf32>
    %98 = arith.mulf %96, %97 : vector<8x8x64xf32>
    %99 = arith.addf %92, %98 : vector<8x8x64xf32>
    %100 = vector.extract_strided_slice %2 {offsets = [0, 7], sizes = [8, 1], strides = [1, 1]} : vector<8x8xf32> to vector<8x1xf32>
    %101 = vector.extract_strided_slice %51 {offsets = [0, 7, 0], sizes = [8, 1, 64], strides = [1, 1, 1]} : vector<8x8x64xf32> to vector<8x1x64xf32>
    %102 = vector.shape_cast %100 : vector<8x1xf32> to vector<1x8x1xf32>
    %103 = vector.broadcast %102 : vector<1x8x1xf32> to vector<8x8x64xf32>
    %104 = vector.broadcast %101 : vector<8x1x64xf32> to vector<8x8x64xf32>
    %105 = arith.mulf %103, %104 : vector<8x8x64xf32>
    %106 = arith.addf %99, %105 : vector<8x8x64xf32>
    %107 = vector.shape_cast %3 : vector<8x1xf32> to vector<1x8x1xf32>
    %108 = vector.broadcast %107 : vector<1x8x1xf32> to vector<8x8x64xf32>
    %109 = arith.addf %106, %108 : vector<8x8x64xf32>
    %cst_23 = arith.constant 0.000000e+00 : f32
    %110 = vector.broadcast %cst_23 : f32 to vector<8x8x64xf32>
    %111 = arith.maximumf %109, %110 : vector<8x8x64xf32>
    %cst_24 = arith.constant dense<0.000000e+00> : vector<8x8xf32>
    %112 = vector.multi_reduction <add>, %111, %cst_24 [2] : vector<8x8x64xf32> to vector<8x8xf32>
    %cst_25 = arith.constant 1.562500e-02 : f32
    %113 = vector.broadcast %cst_25 : f32 to vector<8x8xf32>
    %114 = arith.mulf %112, %113 : vector<8x8xf32>
    %cst_26 = arith.constant dense<0.000000e+00> : vector<8x32xf32>
    %115 = tpu.matmul %114, %4, %cst_26 {dimension_numbers = #tpu.dot_dimension_numbers<[1], [0], [0], [1], [0, 0, 1, 1], [], []>} : vector<8x8xf32>, vector<8x32xf32>, vector<8x32xf32> -> vector<8x32xf32>
    %116 = vector.broadcast %5 : vector<1x32xf32> to vector<8x32xf32>
    %117 = arith.addf %115, %116 : vector<8x32xf32>
    %cst_27 = arith.constant 0.000000e+00 : f32
    %118 = vector.broadcast %cst_27 : f32 to vector<8x32xf32>
    %119 = arith.maximumf %117, %118 : vector<8x32xf32>
    %cst_28 = arith.constant dense<0.000000e+00> : vector<8x128xf32>
    %120 = tpu.matmul %119, %7, %cst_28 {dimension_numbers = #tpu.dot_dimension_numbers<[1], [0], [0], [1], [0, 0, 1, 1], [], []>} : vector<8x32xf32>, vector<32x128xf32>, vector<8x128xf32> -> vector<8x128xf32>
    %121 = vector.broadcast %6 : vector<1x128xf32> to vector<8x128xf32>
    %122 = arith.addf %120, %121 : vector<8x128xf32>
    %cst_29 = arith.constant dense<0.000000e+00> : vector<8x256xf32>
    %123 = tpu.matmul %122, %8, %cst_29 {dimension_numbers = #tpu.dot_dimension_numbers<[1], [0], [0], [1], [0, 0, 1, 1], [], []>} : vector<8x128xf32>, vector<128x256xf32>, vector<8x256xf32> -> vector<8x256xf32>
    %124 = vector.broadcast %11 : vector<1x256xf32> to vector<8x256xf32>
    %125 = arith.addf %123, %124 : vector<8x256xf32>
    %cst_30 = arith.constant 0.000000e+00 : f32
    %126 = vector.broadcast %cst_30 : f32 to vector<8x256xf32>
    %127 = arith.maximumf %125, %126 : vector<8x256xf32>
    %cst_31 = arith.constant dense<0.000000e+00> : vector<8x128xf32>
    %128 = tpu.matmul %127, %9, %cst_31 {dimension_numbers = #tpu.dot_dimension_numbers<[1], [0], [0], [1], [0, 0, 1, 1], [], []>} : vector<8x256xf32>, vector<256x128xf32>, vector<8x128xf32> -> vector<8x128xf32>
    %129 = vector.broadcast %12 : vector<1x128xf32> to vector<8x128xf32>
    %130 = arith.addf %128, %129 : vector<8x128xf32>
    %cst_32 = arith.constant 0.000000e+00 : f32
    %131 = vector.broadcast %cst_32 : f32 to vector<8x128xf32>
    %132 = arith.maximumf %130, %131 : vector<8x128xf32>
    %cst_33 = arith.constant dense<0.000000e+00> : vector<8x48xf32>
    %133 = tpu.matmul %132, %10, %cst_33 {dimension_numbers = #tpu.dot_dimension_numbers<[1], [0], [0], [1], [0, 0, 1, 1], [], []>} : vector<8x128xf32>, vector<128x48xf32>, vector<8x48xf32> -> vector<8x48xf32>
    %134 = vector.broadcast %13 : vector<1x48xf32> to vector<8x48xf32>
    %135 = arith.addf %133, %134 : vector<8x48xf32>
    %136 = math.tanh %135 : vector<8x48xf32>
    %137 = arith.truncf %136 : vector<8x48xf32> to vector<8x48xbf16>
    %c0_34 = arith.constant 0 : index
    %c0_35 = arith.constant 0 : index
    %138 = vector.load %arg5[%c0_34, %c0_35] : memref<48x768xbf16, #tpu.memory_space<vmem>>, vector<48x768xbf16>
    %cst_36 = arith.constant dense<0.000000e+00> : vector<8x768xf32>
    %139 = tpu.matmul %137, %138, %cst_36 {dimension_numbers = #tpu.dot_dimension_numbers<[1], [0], [0], [1], [0, 0, 1, 1], [], []>} : vector<8x48xbf16>, vector<48x768xbf16>, vector<8x768xf32> -> vector<8x768xf32>
    %c0_37 = arith.constant 0 : index
    %c0_38 = arith.constant 0 : index
    %140 = vector.load %arg6[%c0_37, %c0_38] : memref<8x768xf32, #tpu.memory_space<vmem>>, vector<8x768xf32>
    tpu.vector_store %arg6[%c0_37, %c0_38], %139 {strides = array<i32>} : memref<8x768xf32, #tpu.memory_space<vmem>>, vector<8x768xf32>,
    return
  }
  func.func @transform_0(%arg0: i32) -> (i32, i32, i32) {
    %c0_i32 = arith.constant 0 : i32
    %c0_i32_0 = arith.constant 0 : i32
    %c0_i32_1 = arith.constant 0 : i32
    return %arg0, %c0_i32, %c0_i32_0 : i32, i32, i32
  }
  func.func @transform_1(%arg0: i32) -> (i32, i32) {
    %c0_i32 = arith.constant 0 : i32
    %c0_i32_0 = arith.constant 0 : i32
    %c0_i32_1 = arith.constant 0 : i32
    return %c0_i32, %c0_i32_0 : i32, i32
  }
  func.func @transform_2(%arg0: i32) -> (i32, i32) {
    %c0_i32 = arith.constant 0 : i32
    %c0_i32_0 = arith.constant 0 : i32
    %c0_i32_1 = arith.constant 0 : i32
    return %c0_i32, %c0_i32_0 : i32, i32
  }
  func.func @transform_3(%arg0: i32) -> (i32, i32) {
    %c0_i32 = arith.constant 0 : i32
    %c0_i32_0 = arith.constant 0 : i32
    %c0_i32_1 = arith.constant 0 : i32
    return %c0_i32, %c0_i32_0 : i32, i32
  }
  func.func @transform_4(%arg0: i32) -> (i32, i32) {
    %c0_i32 = arith.constant 0 : i32
    %c0_i32_0 = arith.constant 0 : i32
    %c0_i32_1 = arith.constant 0 : i32
    return %c0_i32, %c0_i32_0 : i32, i32
  }
  func.func @transform_5(%arg0: i32) -> (i32, i32) {
    %c0_i32 = arith.constant 0 : i32
    %c0_i32_0 = arith.constant 0 : i32
    return %arg0, %c0_i32 : i32, i32
  }
}

</mosaic_0001>

<bundles_post_ra>
// kernel: simclr_style_transfer_forward.1
= control target key start
LH: loop header
LB: loop body
LE: loop exit
PB: predicated region body
PF: predicated region fallthrough
CT: control target
= control target key end

     0   :  { %10 = vsyncpa [#allocation3], 0  ;;  %s2531_s18 = smov [#allocation2]   ;;  %s3475_s0 = inlined_call_operand.vmem [shape: f32[8,4,256], index: 0, kind: input, shape index: {}]   ;;  %s3476_s1 = inlined_call_operand.vmem [shape: f32[48,128], index: 1, kind: input, shape index: {}]   ;;  %s3477_s2 = inlined_call_operand.vmem [shape: bf16[256,64], index: 2, kind: input, shape index: {}]   ;;  %s3478_s3 = inlined_call_operand.hbm [shape: f32[520,256], index: 3, kind: input, shape index: {}]   ;;  %s3479_s4 = inlined_call_operand.vmem [shape: bf16[48,768], index: 4, kind: input, shape index: {}]   ;;  %s3480_s5 = inlined_call_operand.vmem [shape: f32[8,768], index: 5, kind: output, shape index: {}]  }
   0x1   :  { %s22_s19 = sshll.u32 %s2531_s18, 4  ;;  %s23_s19 = int_to_ptr.vmem [resolvable:$true] %s22_s19 }
   0x2   :  { %s2517_s20 = scalar_lea.vmem %s23_s19, 16640  ;;  %p2522_p1 = scmp.lt.s32.totalorder %s23_s19, %s23_s19 }
   0x3   :  { %p2518_p0 = scmp.ne.s32.totalorder %s23_s19, %s2517_s20  ;;  %p2523_p2 = scmp.lt.s32.totalorder %s2517_s20, %s2517_s20 }
   0x5   :  { %p2524_p3 = por %p2523_p2, %p2522_p1 }
   0x7   :  { %p2525_p4 = pnand %p2524_p3, %p2518_p0 }
   0x9   :  { %2528 = shalt.err (!%p2525_p4)
}
   0xa   :  { %s2532_s21 = smov 256   ;;  %s2533_s22 = smov 16  }
   0xb   :  { %28 = dma.hbm_to_vmem [thread:$0]  %s3478_s3, 16640, %s23_s19, [#allocation3], %s2532_s21, %s2532_s21, %s2533_s22  }
   0xc   :  { %2529 = dma.done.wait [#allocation3], 16640  }
   0xd   :  { %2530 = vsyncadd [#allocation3], 4294950656  ;;  %v3481_v0 = vmov 0   ;;  %v2535_v1 = vmov 2   ;;  %v2588_v2 = vld [vmem:[%s3476_s1] sm:$0xff]  ;;  %v2463_v3 = vld [vmem:[%s3477_s2 + $0x78] sm:$0xff]   ;;  %v3483_v31 = vlaneseq }
   0xe   :  { %2448 = vset.pattern.permute.xlu0 %v3481_v0  ;;  %2450 = vset.pattern.permute.xlu1 %v2535_v1  ;;  %v2464_v4 = vld [vmem:[%s3477_s2 + $0x38] sm:$0xff]   ;;  %v2465_v5 = vld [vmem:[%s3477_s2 + $0x70] sm:$0xff]   ;;  %v2536_v7 = vmov 1   ;;  %v2537_v8 = vmov 3   ;;  %v2467_v9 = vld [vmem:[%s3477_s2 + $0x68] sm:$0xff]   ;;  %v2538_v12 = vmov 4  }
   0xf   :  { %136 = vperm.xlu0 %2448, %v2588_v2   ;;  %488 = vperm.xlu1 %2450, %v2588_v2   ;;  %v2466_v6 = vld [vmem:[%s3477_s2 + $0x30] sm:$0xff]   ;;  %v2468_v10 = vld [vmem:[%s3477_s2 + $0x28] sm:$0xff]   ;;  %v2469_v11 = vld [vmem:[%s3477_s2 + $0x60] sm:$0xff]   ;;  %v2539_v22 = vmov 9   ;;  %v2540_v23 = vmov 8   ;;  %v2541_v24 = vmov 10  }
  0x10   :  { %2278 = vmatprep.subr.bf16.mxu0 %v2463_v3  ;;  %v2470_v13 = vld [vmem:[%s3477_s2 + $0x20] sm:$0xff]   ;;  %v2471_v14 = vld [vmem:[%s3477_s2 + $0x58] sm:$0xff]   ;;  %v2473_v16 = vld [vmem:[%s3477_s2 + $0x50] sm:$0xff]   ;;  %v2542_v25 = vmov 11   ;;  %v2543_v26 = vmov 12   ;;  %v2544_v27 = vmov 14  }
  0x11   :  { %2279 = vmatpush3.bf16.msra.mxu0 %v2464_v4  ;;  %v2472_v15 = vld [vmem:[%s3477_s2 + $0x18] sm:$0xff]   ;;  %v2474_v17 = vld [vmem:[%s3477_s2 + $0x10] sm:$0xff]   ;;  %v2475_v18 = vld [vmem:[%s3477_s2 + $0x48] sm:$0xff]   ;;  %v2545_v28 = vmov 13   ;;  %v2546_v29 = vmov 16   ;;  %v2547_v30 = vmov 15  }
  0x12   :  { %2280 = vmatprep.subr.bf16.mxu0 %v2465_v5  ;;  %v2476_v19 = vld [vmem:[%s3477_s2 + $0x8] sm:$0xff]   ;;  %v2477_v20 = vld [vmem:[%s3477_s2 + $0x40] sm:$0xff]   ;;  %v2653_v32 = vshrl.u32 %v3483_v31, 7  ;;  %v128_v4 = vld [vmem:[%s3475_s0 + $0x10] sm:$0xff]  ;;  %vm1512_vm0 = vcmask 523264   ;;  %s2548_s23 = smov 96  }
  0x13   :  { %2449 = vset.pattern.permute.xlu0 %v2536_v7  ;;  %2451 = vset.pattern.permute.xlu1 %v2537_v8  ;;  %v2478_v21 = vld [vmem:[%s3477_s2] sm:$0xff]   ;;  %v127_v36 = vld [vmem:[%s3475_s0 + $0x8] sm:$0xff]  ;;  %v129_v5 = vld [vmem:[%s3475_s0 + $0x18] sm:$0xff]  ;;  %vm2550_vm1 = vmmov 0   ;;  %vm1591_vm2 = vcmask 1041409   ;;  %vm1593_vm3 = vcmask 1042434  }
  0x14   :  { %308 = vperm.xlu0 %2449, %v2588_v2   ;;  %668 = vperm.xlu1 %2451, %v2588_v2   ;;  %3501 = vst [vmem:[#allocation5_spill] sm:$0xff] %v2653_v32  ;;  %v2656_v33 = vsub.s32 4, %v2653_v32  ;;  %v2659_v34 = vsub.s32 5, %v2653_v32  ;;  %v126_v35 = vld [vmem:[%s3475_s0] sm:$0xff]  ;;  %v2668_v37 = vsub.s32 6, %v2653_v32  ;;  %v2671_v38 = vsub.s32 7, %v2653_v32 }
  0x15   :  { %2281 = vmatpush3.bf16.msra.mxu0 %v2466_v6  ;;  %v2674_v39 = vsub.s32 0, %v2653_v32  ;;  %v2677_v40 = vsub.s32 1, %v2653_v32  ;;  %v2680_v41 = vsub.s32 2, %v2653_v32  ;;  %v2683_v42 = vsub.s32 3, %v2653_v32 }
  0x16   :  { %2282 = vmatprep.subr.bf16.mxu0 %v2467_v9  ;;  %3502 = vst [vmem:[#allocation6_spill] sm:$0xff] %v2656_v33  ;;  %3503 = vst [vmem:[#allocation7_spill] sm:$0xff] %v2659_v34  ;;  %v154_v43 = vrot.slane %v126_v35, %v2656_v33  ;;  %v162_v44 = vrot.slane %v127_v36, %v2656_v33  ;;  %v318_v45 = vrot.slane %v126_v35, %v2659_v34  ;;  %vm1595_vm4 = vcmask 1043459  }
  0x17   :  { %3504 = vst [vmem:[#allocation8_spill] sm:$0xff] %v2668_v37  ;;  %3505 = vst [vmem:[#allocation9_spill] sm:$0xff] %v2671_v38  ;;  %v326_v46 = vrot.slane %v127_v36, %v2659_v34  ;;  %v498_v47 = vrot.slane %v126_v35, %v2668_v37  ;;  %v506_v48 = vrot.slane %v127_v36, %v2668_v37  ;;  %vm1597_vm5 = vcmask 1044484  }
  0x18   :  { %2452 = vset.pattern.permute.xlu1 %v2538_v12  ;;  %2453 = vset.pattern.permute.xlu0 %v2540_v23  ;;  %3506 = vst [vmem:[#allocation10_spill] sm:$0xff] %v2674_v39  ;;  %3507 = vst [vmem:[#allocation11_spill] sm:$0xff] %v2677_v40  ;;  %v678_v49 = vrot.slane %v126_v35, %v2671_v38  ;;  %v686_v50 = vrot.slane %v127_v36, %v2671_v38  ;;  %vm1599_vm6 = vcmask 1045509   ;;  %vm1601_vm7 = vcmask 1046534  }
  0x19   :  { %848 = vperm.xlu1 %2452, %v2588_v2   ;;  %2283 = vmatpush3.bf16.msra.mxu0 %v2468_v10  ;;  %3508 = vst [vmem:[#allocation12_spill] sm:$0xff] %v2680_v41  ;;  %3509 = vst [vmem:[#allocation13_spill] sm:$0xff] %v2683_v42  ;;  %v150_v51 = vrot.slane %v126_v35, %v2674_v39  ;;  %v158_v52 = vrot.slane %v127_v36, %v2674_v39  ;;  %vm1603_vm8 = vcmask 1047559   ;;  %vm1612_vm9 = vcmask 64512  }
  0x1a   :  { %2284 = vmatprep.subr.bf16.mxu0 %v2469_v11  ;;  %1085 = vperm.xlu0 %2453, %v2588_v2   ;;  %v314_v53 = vrot.slane %v126_v35, %v2677_v40  ;;  %v322_v54 = vrot.slane %v127_v36, %v2677_v40  ;;  %v494_v55 = vrot.slane %v126_v35, %v2680_v41  ;;  %vm1690_vm10 = vcmask 261120  }
  0x1b   :  { %v502_v56 = vrot.slane %v127_v36, %v2680_v41  ;;  %v674_v57 = vrot.slane %v126_v35, %v2683_v42  ;;  %v682_v58 = vrot.slane %v127_v36, %v2683_v42  ;;  %v2702_v59 = vrot.slane %v154_v43, %v2674_v39 }
  0x1c   :  { %v2705_v60 = vrot.slane %v162_v44, %v2674_v39  ;;  %v2708_v61 = vrot.slane %v318_v45, %v2677_v40  ;;  %v2711_v62 = vrot.slane %v326_v46, %v2677_v40  ;;  %v2714_v63 = vrot.slane %v498_v47, %v2680_v41 }
  0x1d   :  { %2285 = vmatpush3.bf16.msra.mxu0 %v2470_v13  ;;  %2454 = vset.pattern.permute.xlu1 %v2539_v22  ;;  %v2717_v1 = vrot.slane %v506_v48, %v2680_v41  ;;  %v2723_v3 = vrot.slane %v686_v50, %v2683_v42  ;;  %v2732_v6 = vrot.slane %v150_v51, %v2674_v39  ;;  %v130_v48 = vld [vmem:[%s3475_s0 + $0x20] sm:$0xff]  ;;  %vm2099_vm11 = vcmask 392192  }
  0x1e   :  { %2286 = vmatprep.subr.bf16.mxu0 %v2471_v14  ;;  %1129 = vperm.xlu1 %2454, %v2588_v2   ;;  %v2735_v7 = vrot.slane %v158_v52, %v2674_v39  ;;  %v2738_v8 = vrot.slane %v314_v53, %v2677_v40  ;;  %v2741_v9 = vrot.slane %v322_v54, %v2677_v40 }
  0x1f   :  { %2456 = vset.pattern.permute.xlu0 %v2542_v25  ;;  %v2744_v10 = vrot.slane %v494_v55, %v2680_v41  ;;  %v2747_v11 = vrot.slane %v502_v56, %v2680_v41  ;;  %v2750_v12 = vrot.slane %v674_v57, %v2683_v42  ;;  %v2753_v13 = vrot.slane %v682_v58, %v2683_v42 }
  0x20   :  { %1233 = vperm.xlu0 %2456, %v2588_v2   ;;  %v170_v14 = vrot.slane %v128_v4, %v2656_v33  ;;  %v166_v22 = vrot.slane %v128_v4, %v2674_v39  ;;  %v174_v23 = vrot.slane %v129_v5, %v2674_v39  ;;  %v338_v25 = vrot.slane %v129_v5, %v2677_v40 }
  0x21   :  { %2287 = vmatpush3.bf16.msra.mxu0 %v2472_v15  ;;  %v178_v15 = vrot.slane %v129_v5, %v2656_v33  ;;  %v186_v58 = vrot.slane %v130_v48, %v2656_v33 }
  0x22   :  { %2288 = vmatprep.subr.bf16.mxu0 %v2473_v16  ;;  %2455 = vset.pattern.permute.xlu1 %v2541_v24  ;;  %v334_v16 = vrot.slane %v128_v4, %v2659_v34  ;;  %v330_v24 = vrot.slane %v128_v4, %v2677_v40  ;;  %v2802_v50 = vrot.slane %v166_v22, %v2674_v39 }
  0x23   :  { %1181 = vperm.xlu1 %2455, %v2588_v2   ;;  %v2775_v35 = vrot.slane %v178_v15, %v2674_v39  ;;  %v2805_v51 = vrot.slane %v174_v23, %v2674_v39  ;;  %v2811_v53 = vrot.slane %v338_v25, %v2677_v40  ;;  %v530_v15 = vrot.slane %v130_v48, %v2668_v37 }
  0x24   :  { %2459 = vset.pattern.permute.xlu0 %v2544_v27  ;;  %v518_v27 = vrot.slane %v129_v5, %v2680_v41  ;;  %v2778_v36 = vrot.slane %v334_v16, %v2677_v40  ;;  %v2808_v52 = vrot.slane %v330_v24, %v2677_v40  ;;  %v526_v23 = vrot.slane %v130_v48, %v2680_v41 }
  0x25   :  { %2289 = vmatpush3.bf16.msra.mxu0 %v2474_v17  ;;  %1389 = vperm.xlu0 %2459, %v2588_v2   ;;  %v342_v17 = vrot.slane %v129_v5, %v2659_v34  ;;  %v706_v25 = vrot.slane %v130_v48, %v2683_v42  ;;  %v2854_v31 = vrot.slane %v530_v15, %v2680_v41 }
  0x26   :  { %2290 = vmatprep.subr.bf16.mxu0 %v2475_v18  ;;  %v514_v18 = vrot.slane %v128_v4, %v2668_v37  ;;  %v2817_v55 = vrot.slane %v518_v27, %v2680_v41  ;;  %v2842_v27 = vrot.slane %v186_v58, %v2674_v39  ;;  %v132_v58 = vld [vmem:[%s3475_s0 + $0x30] sm:$0xff] }
  0x27   :  { %2457 = vset.pattern.permute.xlu1 %v2543_v26  ;;  %v510_v26 = vrot.slane %v128_v4, %v2680_v41  ;;  %v2781_v43 = vrot.slane %v342_v17, %v2677_v40  ;;  %v710_v17 = vrot.slane %v130_v48, %v2671_v38 }
  0x28   :  { %1285 = vperm.xlu1 %2457, %v2588_v2   ;;  %v2784_v44 = vrot.slane %v514_v18, %v2680_v41 }
  0x29   :  { %2291 = vmatpush3.bf16.msra.mxu0 %v2476_v19  ;;  %2462 = vset.pattern.permute.xlu0 %v2546_v29  ;;  %v522_v19 = vrot.slane %v129_v5, %v2668_v37  ;;  %v2814_v54 = vrot.slane %v510_v26, %v2680_v41 }
  0x2a   :  { %2292 = vmatprep.subr.bf16.mxu0 %v2477_v20  ;;  %v694_v20 = vrot.slane %v128_v4, %v2671_v38 }
  0x2b   :  { %v2787_v45 = vrot.slane %v522_v19, %v2680_v41  ;;  %v182_v19 = vrot.slane %v130_v48, %v2674_v39 }
  0x2c   :  { %2458 = vset.pattern.permute.xlu1 %v2545_v28  ;;  %v690_v28 = vrot.slane %v128_v4, %v2683_v42  ;;  %v2790_v46 = vrot.slane %v694_v20, %v2683_v42 }
  0x2d   :  { %2293 = vmatpush3.bf16.msra.mxu0 %v2478_v21  ;;  %1337 = vperm.xlu1 %2458, %v2588_v2   ;;  %v702_v21 = vrot.slane %v129_v5, %v2671_v38 }
  0x2e   :  { %v2820_v56 = vrot.slane %v690_v28, %v2683_v42 }
  0x2f   :  { %v2793_v47 = vrot.slane %v702_v21, %v2683_v42  ;;  %v346_v21 = vrot.slane %v130_v48, %v2677_v40 }
  0x31   :  { %2460 = vset.pattern.permute.xlu1 %v2547_v30  ;;  %v2772_v30 = vrot.slane %v170_v14, %v2674_v39  ;;  %v2878_v15 = vrot.slane %v346_v21, %v2677_v40 }
  0x32   :  { %1441 = vperm.xlu1 %2460, %v2588_v2  }
  0x33   :  { %3516 = vst [vmem:[#allocation20_spill] sm:$0xff] %v2878_v15  ;;  %v366_v15 = vrot.slane %v132_v58, %v2659_v34 }
  0x36   :  { %2461 = vset.pattern.permute.xlu1 %v2546_v29  ;;  %v698_v29 = vrot.slane %v129_v5, %v2683_v42  ;;  %v350_v5 = vrot.slane %v130_v48, %v2659_v34  ;;  %v2860_v48 = vrot.slane %v710_v17, %v2683_v42  ;;  %v2884_v17 = vrot.slane %v526_v23, %v2680_v41 }
  0x37   :  { %1493 = vperm.xlu1 %2461, %v2588_v2   ;;  %v2720_v2 = vrot.slane %v678_v49, %v2683_v42  ;;  %v131_v49 = vld [vmem:[%s3475_s0 + $0x28] sm:$0xff]  ;;  %v546_v23 = vrot.slane %v132_v58, %v2668_v37 }
  0x38   :  { %v2823_v57 = vrot.slane %v698_v29, %v2683_v42  ;;  %v194_v4 = vrot.slane %v131_v49, %v2656_v33  ;;  %v358_v14 = vrot.slane %v131_v49, %v2659_v34  ;;  %v538_v16 = vrot.slane %v131_v49, %v2668_v37  ;;  %3512 = vst [vmem:[#allocation16_spill] sm:$0xff] %v2860_v48 }
  0x39   :  { %v718_v18 = vrot.slane %v131_v49, %v2671_v38  ;;  %v190_v20 = vrot.slane %v131_v49, %v2674_v39  ;;  %v354_v22 = vrot.slane %v131_v49, %v2677_v40  ;;  %v534_v24 = vrot.slane %v131_v49, %v2680_v41  ;;  %3518 = vst [vmem:[#allocation22_spill] sm:$0xff] %v2884_v17 }
  0x3a   :  { %v714_v26 = vrot.slane %v131_v49, %v2683_v42  ;;  %v2845_v28 = vrot.slane %v194_v4, %v2674_v39  ;;  %v2848_v29 = vrot.slane %v350_v5, %v2677_v40  ;;  %v2851_v0 = vrot.slane %v358_v14, %v2677_v40  ;;  %v133_v4 = vld [vmem:[%s3475_s0 + $0x38] sm:$0xff] }
  0x3b   :  { %v2857_v32 = vrot.slane %v538_v16, %v2680_v41  ;;  %v2863_v49 = vrot.slane %v718_v18, %v2683_v42  ;;  %v2872_v5 = vrot.slane %v182_v19, %v2674_v39  ;;  %v2875_v14 = vrot.slane %v190_v20, %v2674_v39 }
  0x3c   :  { %3510 = vst [vmem:[#allocation14_spill] sm:$0xff] %v2848_v29  ;;  %3511 = vst [vmem:[#allocation15_spill] sm:$0xff] %v2851_v0  ;;  %v2881_v16 = vrot.slane %v354_v22, %v2677_v40  ;;  %v2887_v18 = vrot.slane %v534_v24, %v2680_v41  ;;  %v2893_v19 = vrot.slane %v714_v26, %v2683_v42 }
  0x3d   :  { %3513 = vst [vmem:[#allocation17_spill] sm:$0xff] %v2863_v49  ;;  %3514 = vst [vmem:[#allocation18_spill] sm:$0xff] %v2872_v5  ;;  %v2890_v49 = vrot.slane %v706_v25, %v2683_v42  ;;  %v202_v20 = vrot.slane %v132_v58, %v2656_v33  ;;  %v210_v21 = vrot.slane %v133_v4, %v2656_v33 }
  0x3e   :  { %3515 = vst [vmem:[#allocation19_spill] sm:$0xff] %v2875_v14  ;;  %3517 = vst [vmem:[#allocation21_spill] sm:$0xff] %v2881_v16  ;;  %v374_v22 = vrot.slane %v133_v4, %v2659_v34  ;;  %v554_v17 = vrot.slane %v133_v4, %v2668_v37  ;;  %v726_v24 = vrot.slane %v132_v58, %v2671_v38 }
  0x3f   :  { %3519 = vst [vmem:[#allocation23_spill] sm:$0xff] %v2887_v18  ;;  %3520 = vst [vmem:[#allocation24_spill] sm:$0xff] %v2890_v49  ;;  %v734_v25 = vrot.slane %v133_v4, %v2671_v38  ;;  %v198_v49 = vrot.slane %v132_v58, %v2674_v39  ;;  %v206_v26 = vrot.slane %v133_v4, %v2674_v39 }
  0x40   :  { %3521 = vst [vmem:[#allocation25_spill] sm:$0xff] %v2893_v19  ;;  %v362_v19 = vrot.slane %v132_v58, %v2677_v40  ;;  %v370_v33 = vrot.slane %v133_v4, %v2677_v40  ;;  %v542_v18 = vrot.slane %v132_v58, %v2680_v41  ;;  %v550_v34 = vrot.slane %v133_v4, %v2680_v41 }
  0x41   :  { %v722_v16 = vrot.slane %v132_v58, %v2683_v42  ;;  %v730_v37 = vrot.slane %v133_v4, %v2683_v42  ;;  %v2912_v14 = vrot.slane %v202_v20, %v2674_v39  ;;  %v2915_v38 = vrot.slane %v210_v21, %v2674_v39 }
  0x42   :  { %v2918_v5 = vrot.slane %v366_v15, %v2677_v40  ;;  %v2921_v48 = vrot.slane %v374_v22, %v2677_v40  ;;  %v2924_v0 = vrot.slane %v546_v23, %v2680_v41  ;;  %v2927_v29 = vrot.slane %v554_v17, %v2680_v41 }
  0x43   :  { %v2930_v58 = vrot.slane %v726_v24, %v2683_v42  ;;  %v2933_v4 = vrot.slane %v734_v25, %v2683_v42  ;;  %v2936_v20 = vrot.slane %v198_v49, %v2674_v39  ;;  %v2939_v15 = vrot.slane %v206_v26, %v2674_v39 }
  0x44   :  { %v2942_v21 = vrot.slane %v362_v19, %v2677_v40  ;;  %v2945_v22 = vrot.slane %v370_v33, %v2677_v40  ;;  %v2952_v24 = vrot.slane %v542_v18, %v2680_v41  ;;  %v2955_v25 = vrot.slane %v550_v34, %v2680_v41 }
  0x45   :  { %v2958_v49 = vrot.slane %v722_v16, %v2683_v42  ;;  %v2961_v26 = vrot.slane %v730_v37, %v2683_v42 }
  0x46   :  { %3522 = vst [vmem:[#allocation26_spill] sm:$0xff] %v2952_v24  ;;  %3523 = vst [vmem:[#allocation27_spill] sm:$0xff] %v2955_v25 }
  0x47   :  { %3524 = vst [vmem:[#allocation28_spill] sm:$0xff] %v2958_v49  ;;  %3525 = vst [vmem:[#allocation29_spill] sm:$0xff] %v2961_v26 }
  0x8a   :  { %v2947_v17 = vpop.permute.xlu0 %136  ;;  %v2949_v23 = vpop.permute.xlu1 %488 }
  0x8b   :  { %v292_v33 = vmul.f32 %v2702_v59, %v2947_v17  ;;  %v294_v19 = vmul.f32 %v2705_v60, %v2947_v17  ;;  %v636_v40 = vmul.f32 %v2714_v63, %v2949_v23  ;;  %v638_v18 = vmul.f32 %v2717_v1, %v2949_v23 }
  0x8c   :  { %v291_v34 = vmul.f32 %v2732_v6, %v2947_v17  ;;  %v293_v16 = vmul.f32 %v2735_v7, %v2947_v17  ;;  %v635_v37 = vmul.f32 %v2744_v10, %v2949_v23  ;;  %v637_v59 = vmul.f32 %v2747_v11, %v2949_v23 }
  0x8d   :  { %v296_v60 = vmul.f32 %v2772_v30, %v2947_v17  ;;  %v298_v63 = vmul.f32 %v2775_v35, %v2947_v17  ;;  %v640_v1 = vmul.f32 %v2784_v44, %v2949_v23  ;;  %v642_v6 = vmul.f32 %v2787_v45, %v2949_v23 }
  0x8e   :  { %v295_v7 = vmul.f32 %v2802_v50, %v2947_v17  ;;  %v297_v10 = vmul.f32 %v2805_v51, %v2947_v17  ;;  %v639_v11 = vmul.f32 %v2814_v54, %v2949_v23  ;;  %v641_v30 = vmul.f32 %v2817_v55, %v2949_v23 }
  0x8f   :  { %v2995_v42 = vpop.permute.xlu0 %308  ;;  %v2997_v35 = vpop.permute.xlu1 %668  ;;  %v3001_v44 = vmul.f32 %v2842_v27, %v2947_v17  ;;  %v3005_v45 = vmul.f32 %v2845_v28, %v2947_v17  ;;  %v3009_v50 = vmul.f32 %v2854_v31, %v2949_v23  ;;  %v3013_v51 = vmul.f32 %v2857_v32, %v2949_v23 }
  0x90   :  { %v456_v54 = vmul.f32 %v2708_v61, %v2995_v42  ;;  %v458_v55 = vmul.f32 %v2711_v62, %v2995_v42  ;;  %v816_v27 = vmul.f32 %v2720_v2, %v2997_v35  ;;  %v818_v28 = vmul.f32 %v2723_v3, %v2997_v35 }
  0x91   :  { %v455_v31 = vmul.f32 %v2738_v8, %v2995_v42  ;;  %v457_v41 = vmul.f32 %v2741_v9, %v2995_v42  ;;  %v815_v32 = vmul.f32 %v2750_v12, %v2997_v35  ;;  %v817_v61 = vmul.f32 %v2753_v13, %v2997_v35 }
  0x92   :  { %v472_v39 = vadd.f32 %v456_v54, %v292_v33  ;;  %v474_v62 = vadd.f32 %v458_v55, %v294_v19  ;;  %v460_v2 = vmul.f32 %v2778_v36, %v2995_v42  ;;  %v462_v3 = vmul.f32 %v2781_v43, %v2995_v42 }
  0x93   :  { %v471_v26 = vadd.f32 %v455_v31, %v291_v34  ;;  %v473_v49 = vadd.f32 %v457_v41, %v293_v16  ;;  %v820_v8 = vmul.f32 %v2790_v46, %v2997_v35  ;;  %v822_v9 = vmul.f32 %v2793_v47, %v2997_v35 }
  0x94   :  { %v652_v12 = vadd.f32 %v636_v40, %v472_v39  ;;  %v654_v25 = vadd.f32 %v638_v18, %v474_v62  ;;  %v476_v24 = vadd.f32 %v460_v2, %v296_v60  ;;  %v478_v13 = vadd.f32 %v462_v3, %v298_v63  ;;  %v3039_v33 = vpop.permute.xlu1 %848  ;;  %v3527_v3 = vld [vmem:[#allocation15_spill] sm:$0xff] }
  0x95   :  { %v651_v19 = vadd.f32 %v635_v37, %v471_v26  ;;  %v653_v54 = vadd.f32 %v637_v59, %v473_v49  ;;  %v459_v36 = vmul.f32 %v2808_v52, %v2995_v42  ;;  %v461_v41 = vmul.f32 %v2811_v53, %v2995_v42 }
  0x96   :  { %v832_v43 = vadd.f32 %v816_v27, %v652_v12  ;;  %v834_v34 = vadd.f32 %v818_v28, %v654_v25  ;;  %v656_v46 = vadd.f32 %v640_v1, %v476_v24  ;;  %v658_v16 = vadd.f32 %v642_v6, %v478_v13 }
  0x97   :  { %v831_v55 = vadd.f32 %v815_v32, %v651_v19  ;;  %v833_v47 = vadd.f32 %v817_v61, %v653_v54  ;;  %v475_v39 = vadd.f32 %v459_v36, %v295_v7  ;;  %v477_v40 = vadd.f32 %v461_v41, %v297_v10 }
  0x98   :  { %v852_v18 = vadd.f32 %v3039_v33, %v832_v43  ;;  %v854_v60 = vadd.f32 %v3039_v33, %v834_v34  ;;  %v836_v26 = vadd.f32 %v820_v8, %v656_v46  ;;  %v838_v49 = vadd.f32 %v822_v9, %v658_v16  ;;  %v3530_v43 = vld [vmem:[#allocation18_spill] sm:$0xff] }
  0x99   :  { %v851_v37 = vadd.f32 %v3039_v33, %v831_v55  ;;  %v853_v52 = vadd.f32 %v3039_v33, %v833_v47  ;;  %v655_v59 = vadd.f32 %v639_v11, %v475_v39  ;;  %v657_v53 = vadd.f32 %v641_v30, %v477_v40  ;;  %v3526_v11 = vld [vmem:[#allocation14_spill] sm:$0xff]  ;;  %v3532_v55 = vld [vmem:[#allocation20_spill] sm:$0xff]  ;;  %v3533_v39 = vld [vmem:[#allocation21_spill] sm:$0xff] }
  0x9a   :  { %v868_v63 = vmax.f32 %v852_v18, 0.0  ;;  %v870_v25 = vmax.f32 %v854_v60, 0.0  ;;  %v856_v24 = vadd.f32 %v3039_v33, %v836_v26  ;;  %v858_v1 = vadd.f32 %v3039_v33, %v838_v49 }
  0x9b   :  { %v867_v6 = vmax.f32 %v851_v37, 0.0  ;;  %v869_v7 = vmax.f32 %v853_v52, 0.0  ;;  %v819_v10 = vmul.f32 %v2820_v56, %v2997_v35  ;;  %v821_v27 = vmul.f32 %v2823_v57, %v2997_v35  ;;  %v3528_v56 = vld [vmem:[#allocation16_spill] sm:$0xff]  ;;  %v3529_v57 = vld [vmem:[#allocation17_spill] sm:$0xff] }
  0x9c   :  { %v884_v28 = vpack.c.bf16 %v870_v25, %v868_v63  ;;  %v872_v31 = vmax.f32 %v856_v24, 0.0  ;;  %v874_v32 = vmax.f32 %v858_v1, 0.0  ;;  %v464_v30 = vmul.f32 %v3526_v11, %v2995_v42  ;;  %v3536_v24 = vld [vmem:[#allocation24_spill] sm:$0xff] }
  0x9d   :  { %v883_v61 = vpack.c.bf16 %v869_v7, %v867_v6  ;;  %v835_v62 = vadd.f32 %v819_v10, %v655_v59  ;;  %v837_v2 = vadd.f32 %v821_v27, %v657_v53  ;;  %v466_v8 = vmul.f32 %v3527_v3, %v2995_v42  ;;  %v3537_v6 = vld [vmem:[#allocation25_spill] sm:$0xff] }
  0x9e   :  { %1051 = vmatprep.mubr.bf16.mxu0 %v884_v28  ;;  %v886_v9 = vpack.c.bf16 %v874_v32, %v872_v31  ;;  %v480_v12 = vadd.f32 %v464_v30, %v3001_v44  ;;  %v824_v13 = vmul.f32 %v3528_v56, %v2997_v35  ;;  %v826_v19 = vmul.f32 %v3529_v57, %v2997_v35  ;;  %v3531_v44 = vld [vmem:[#allocation19_spill] sm:$0xff] }
  0x9f   :  { %1052 = vmatmul.mubr.bf16.vlgmr.msra.gmra.mxu0 %v883_v61  ;;  %v855_v54 = vadd.f32 %v3039_v33, %v835_v62  ;;  %v857_v36 = vadd.f32 %v3039_v33, %v837_v2  ;;  %v482_v41 = vadd.f32 %v466_v8, %v3005_v45  ;;  %v299_v34 = vmul.f32 %v3530_v43, %v2947_v17  ;;  %v3534_v45 = vld [vmem:[#allocation22_spill] sm:$0xff] }
  0xa0   :  { %1059 = vmatprep.mubr.bf16.mxu0 %v886_v9  ;;  %v660_v46 = vadd.f32 %v3009_v50, %v480_v12  ;;  %v301_v16 = vmul.f32 %v3531_v44, %v2947_v17  ;;  %v463_v47 = vmul.f32 %v3532_v55, %v2995_v42  ;;  %v465_v40 = vmul.f32 %v3533_v39, %v2995_v42  ;;  %v3535_v50 = vld [vmem:[#allocation23_spill] sm:$0xff] }
  0xa1   :  { %v871_v18 = vmax.f32 %v855_v54, 0.0  ;;  %v873_v60 = vmax.f32 %v857_v36, 0.0  ;;  %v662_v26 = vadd.f32 %v3013_v51, %v482_v41  ;;  %v643_v49 = vmul.f32 %v3534_v45, %v2949_v23 }
  0xa2   :  { %v840_v37 = vadd.f32 %v824_v13, %v660_v46  ;;  %v479_v52 = vadd.f32 %v463_v47, %v299_v34  ;;  %v481_v59 = vadd.f32 %v465_v40, %v301_v16  ;;  %v645_v53 = vmul.f32 %v3535_v50, %v2949_v23  ;;  %v3538_v34 = vld [vmem:[#allocation26_spill] sm:$0xff]  ;;  %v3540_v47 = vld [vmem:[#allocation28_spill] sm:$0xff]  ;;  %v3541_v40 = vld [vmem:[#allocation29_spill] sm:$0xff] }
  0xa3   :  { %v885_v63 = vpack.c.bf16 %v873_v60, %v871_v18  ;;  %v842_v25 = vadd.f32 %v826_v19, %v662_v26  ;;  %v823_v1 = vmul.f32 %v3536_v24, %v2997_v35  ;;  %v825_v7 = vmul.f32 %v3537_v6, %v2997_v35 }
  0xa4   :  { %v860_v10 = vadd.f32 %v3039_v33, %v840_v37  ;;  %v659_v51 = vadd.f32 %v643_v49, %v479_v52  ;;  %v661_v27 = vadd.f32 %v645_v53, %v481_v59  ;;  %v304_v28 = vmul.f32 %v2912_v14, %v2947_v17 }
  0xa5   :  { %v862_v31 = vadd.f32 %v3039_v33, %v842_v25  ;;  %v306_v32 = vmul.f32 %v2915_v38, %v2947_v17  ;;  %v468_v11 = vmul.f32 %v2918_v5, %v2995_v42  ;;  %v470_v30 = vmul.f32 %v2921_v48, %v2995_v42  ;;  %v3129_v25 = vpop.permute.xlu0 %1085 }
  0xa6   :  { %v876_v61 = vmax.f32 %v860_v10, 0.0  ;;  %v839_v62 = vadd.f32 %v823_v1, %v659_v51  ;;  %v841_v2 = vadd.f32 %v825_v7, %v661_v27  ;;  %v648_v3 = vmul.f32 %v2924_v0, %v2949_v23  ;;  %v3542_v27 = vld [vmem:[#allocation10_spill] sm:$0xff] }
  0xa7   :  { %1060 = vmatmul.mubr.bf16.gmra.mxu0 %v885_v63  ;;  %v878_v8 = vmax.f32 %v862_v31, 0.0  ;;  %v484_v14 = vadd.f32 %v468_v11, %v304_v28  ;;  %v486_v9 = vadd.f32 %v470_v30, %v306_v32  ;;  %v650_v12 = vmul.f32 %v2927_v29, %v2949_v23  ;;  %v3125_v63 = vpop.permute.xlu1 %1129  ;;  %v3543_v28 = vld [vmem:[#allocation11_spill] sm:$0xff]  ;;  %v3544_v32 = vld [vmem:[#allocation12_spill] sm:$0xff] }
  0xa8   :  { %v859_v38 = vadd.f32 %v3039_v33, %v839_v62  ;;  %v861_v5 = vadd.f32 %v3039_v33, %v841_v2  ;;  %v828_v48 = vmul.f32 %v2930_v58, %v2997_v35  ;;  %v830_v56 = vmul.f32 %v2933_v4, %v2997_v35  ;;  %v3546_v2 = vld [vmem:[#allocation6_spill] sm:$0xff] }
  0xa9   :  { %v888_v13 = vpack.c.bf16 %v878_v8, %v876_v61  ;;  %v664_v57 = vadd.f32 %v648_v3, %v484_v14  ;;  %v666_v0 = vadd.f32 %v650_v12, %v486_v9  ;;  %v303_v19 = vmul.f32 %v2936_v20, %v2947_v17  ;;  %v3539_v20 = vld [vmem:[#allocation27_spill] sm:$0xff]  ;;  %v3133_v10 = vpop.permute.xlu0 %1233  ;;  %v3545_v61 = vld [vmem:[#allocation13_spill] sm:$0xff] }
  0xaa   :  { %v875_v54 = vmax.f32 %v859_v38, 0.0  ;;  %v877_v36 = vmax.f32 %v861_v5, 0.0  ;;  %v305_v29 = vmul.f32 %v2939_v15, %v2947_v17  ;;  %v467_v41 = vmul.f32 %v2942_v21, %v2995_v42  ;;  %v3547_v5 = vld [vmem:[#allocation7_spill] sm:$0xff] }
  0xab   :  { %1067 = vmatprep.mubr.bf16.mxu0 %v888_v13  ;;  %v844_v43 = vadd.f32 %v828_v48, %v664_v57  ;;  %v846_v58 = vadd.f32 %v830_v56, %v666_v0  ;;  %v469_v4 = vmul.f32 %v2945_v22, %v2995_v42  ;;  %v647_v46 = vmul.f32 %v3538_v34, %v2949_v23  ;;  %v3548_v56 = vld [vmem:[#allocation8_spill] sm:$0xff]  ;;  %v3549_v57 = vld [vmem:[#allocation9_spill] sm:$0xff] }
  0xac   :  { %v887_v44 = vpack.c.bf16 %v877_v36, %v875_v54  ;;  %v483_v16 = vadd.f32 %v467_v41, %v303_v19  ;;  %v649_v55 = vmul.f32 %v3539_v20, %v2949_v23  ;;  %v827_v15 = vmul.f32 %v3540_v47, %v2997_v35 }
  0xad   :  { %v864_v17 = vadd.f32 %v3039_v33, %v844_v43  ;;  %v866_v21 = vadd.f32 %v3039_v33, %v846_v58  ;;  %v485_v39 = vadd.f32 %v469_v4, %v305_v29  ;;  %v829_v18 = vmul.f32 %v3541_v40, %v2997_v35  ;;  %v3127_v35 = vpop.permute.xlu1 %1181  ;;  %v3147_v19 = vpop.permute.xlu0 %1389 }
  0xae   :  { %v663_v42 = vadd.f32 %v647_v46, %v483_v16 }
  0xaf   :  { %1068 = vmatmul.mubr.bf16.gmra.mxu0 %v887_v44  ;;  %v880_v22 = vmax.f32 %v864_v17, 0.0  ;;  %v882_v60 = vmax.f32 %v866_v21, 0.0  ;;  %v665_v26 = vadd.f32 %v649_v55, %v485_v39 }
  0xb0   :  { %v843_v45 = vadd.f32 %v827_v15, %v663_v42 }
  0xb1   :  { %v890_v49 = vpack.c.bf16 %v882_v60, %v880_v22  ;;  %v845_v37 = vadd.f32 %v829_v18, %v665_v26  ;;  %v3131_v1 = vpop.permute.xlu1 %1285 }
  0xb2   :  { %v863_v23 = vadd.f32 %v3039_v33, %v843_v45 }
  0xb3   :  { %1075 = vmatprep.mubr.bf16.mxu0 %v890_v49  ;;  %v865_v52 = vadd.f32 %v3039_v33, %v845_v37 }
  0xb4   :  { %v879_v59 = vmax.f32 %v863_v23, 0.0 }
  0xb5   :  { %v881_v50 = vmax.f32 %v865_v52, 0.0  ;;  %v3140_v8 = vpop.permute.xlu1 %1337 }
  0xb7   :  { %v889_v53 = vpack.c.bf16 %v881_v50, %v879_v59 }
  0xb9   :  { %1076 = vmatmul.mubr.bf16.gmra.mxu0 %v889_v53  ;;  %v3164_v40 = vpop.permute.xlu1 %1441 }
 0x15f   :  { %v2294_v24 = vpop.f32.mrf.mxu0 }
 0x161   :  { %v2295_v6 = vpop.f32.mrf.mxu0 }
 0x162   :  { %v2296_v7 = vadd.f32 %v2295_v6, %v2294_v24 }
 0x163   :  { %v2297_v51 = vpop.f32.mrf.mxu0 }
 0x164   :  { %v1091_v33 = vrot.slane %v2296_v7, %v3542_v27  ;;  %v1135_v31 = vrot.slane %v2296_v7, %v3543_v28  ;;  %v1187_v11 = vrot.slane %v2296_v7, %v3544_v32  ;;  %v1239_v62 = vrot.slane %v2296_v7, %v3545_v61 }
 0x165   :  { %v2298_v30 = vpop.f32.mrf.mxu0  ;;  %v1291_v3 = vrot.slane %v2296_v7, %v3546_v2  ;;  %v1343_v48 = vrot.slane %v2296_v7, %v3547_v5  ;;  %v1395_v13 = vrot.slane %v2296_v7, %v3548_v56  ;;  %v1447_v0 = vrot.slane %v2296_v7, %v3549_v57 }
 0x166   :  { %v2299_v14 = vadd.f32 %v2298_v30, %v2297_v51  ;;  %v1120_v9 = vmul.f32 %v1091_v33, %v3129_v25  ;;  %v1164_v12 = vmul.f32 %v1135_v31, %v3125_v63  ;;  %v1216_v36 = vmul.f32 %v1187_v11, %v3127_v35 }
 0x167   :  { %v2300_v38 = vpop.f32.mrf.mxu0  ;;  %v1268_v58 = vmul.f32 %v1239_v62, %v3133_v10  ;;  %v1320_v4 = vmul.f32 %v1291_v3, %v3131_v1  ;;  %v1372_v15 = vmul.f32 %v1343_v48, %v3140_v8  ;;  %v1424_v17 = vmul.f32 %v1395_v13, %v3147_v19 }
 0x168   :  { %v1172_v54 = vadd.f32 %v1164_v12, %v1120_v9  ;;  %v1095_v29 = vrot.slane %v2299_v14, %v3542_v27  ;;  %v1139_v41 = vrot.slane %v2299_v14, %v3543_v28  ;;  %v1191_v34 = vrot.slane %v2299_v14, %v3544_v32 }
 0x169   :  { %v2301_v43 = vpop.f32.mrf.mxu0  ;;  %v1243_v46 = vrot.slane %v2299_v14, %v3545_v61  ;;  %v1295_v21 = vrot.slane %v2299_v14, %v3546_v2  ;;  %v1347_v39 = vrot.slane %v2299_v14, %v3547_v5  ;;  %v1399_v45 = vrot.slane %v2299_v14, %v3548_v56 }
 0x16a   :  { %v3156_v44 = vadd.f32 %v2301_v43, %v2300_v38  ;;  %v1224_v16 = vadd.f32 %v1216_v36, %v1172_v54  ;;  %v1121_v20 = vmul.f32 %v1095_v29, %v3129_v25  ;;  %v1165_v55 = vmul.f32 %v1139_v41, %v3125_v63  ;;  %v3191_v29 = vpop.permute.xlu1 %1493 }
 0x16b   :  { %v2303_v47 = vpop.f32.mrf.mxu0  ;;  %v1217_v22 = vmul.f32 %v1191_v34, %v3127_v35  ;;  %v1269_v60 = vmul.f32 %v1243_v46, %v3133_v10  ;;  %v1451_v50 = vrot.slane %v2299_v14, %v3549_v57  ;;  %v1476_v6 = vmul.f32 %v1447_v0, %v3164_v40 }
 0x16c   :  { %v1276_v18 = vadd.f32 %v1268_v58, %v1224_v16  ;;  %v1173_v42 = vadd.f32 %v1165_v55, %v1121_v20  ;;  %v1099_v49 = vrot.slane %v3156_v44, %v3542_v27  ;;  %v1143_v37 = vrot.slane %v3156_v44, %v3543_v28 }
 0x16d   :  { %v2304_v26 = vpop.f32.mrf.mxu0  ;;  %v1195_v23 = vrot.slane %v3156_v44, %v3544_v32  ;;  %v1247_v53 = vrot.slane %v3156_v44, %v3545_v61  ;;  %v1321_v7 = vmul.f32 %v1295_v21, %v3131_v1  ;;  %v1373_v62 = vmul.f32 %v1347_v39, %v3140_v8 }
 0x16e   :  { %v1328_v52 = vadd.f32 %v1320_v4, %v1276_v18  ;;  %v1225_v59 = vadd.f32 %v1217_v22, %v1173_v42  ;;  %v1122_v51 = vmul.f32 %v1099_v49, %v3129_v25  ;;  %v1166_v33 = vmul.f32 %v1143_v37, %v3125_v63 }
 0x16f   :  { %v2306_v24 = vpop.f32.mrf.mxu0  ;;  %v3182_v31 = vadd.f32 %v2304_v26, %v2303_v47  ;;  %v1425_v14 = vmul.f32 %v1399_v45, %v3147_v19  ;;  %v1218_v12 = vmul.f32 %v1195_v23, %v3127_v35  ;;  %v1299_v38 = vrot.slane %v3156_v44, %v3546_v2 }
 0x170   :  { %v1380_v11 = vadd.f32 %v1372_v15, %v1328_v52  ;;  %v1277_v30 = vadd.f32 %v1269_v60, %v1225_v59  ;;  %v1174_v9 = vadd.f32 %v1166_v33, %v1122_v51  ;;  %v1477_v0 = vmul.f32 %v1451_v50, %v3164_v40 }
 0x171   :  { %v2307_v3 = vpop.f32.mrf.mxu0  ;;  %v1270_v54 = vmul.f32 %v1247_v53, %v3133_v10  ;;  %v1351_v43 = vrot.slane %v3156_v44, %v3547_v5  ;;  %v1403_v58 = vrot.slane %v3156_v44, %v3548_v56  ;;  %v1455_v4 = vrot.slane %v3156_v44, %v3549_v57 }
 0x172   :  { %v1432_v48 = vadd.f32 %v1424_v17, %v1380_v11  ;;  %v1329_v13 = vadd.f32 %v1321_v7, %v1277_v30  ;;  %v1226_v41 = vadd.f32 %v1218_v12, %v1174_v9  ;;  %v1103_v16 = vrot.slane %v3182_v31, %v3542_v27 }
 0x173   :  { %v2309_v36 = vpop.f32.mrf.mxu0  ;;  %v1147_v20 = vrot.slane %v3182_v31, %v3543_v28  ;;  %v1322_v15 = vmul.f32 %v1299_v38, %v3131_v1  ;;  %v1199_v17 = vrot.slane %v3182_v31, %v3544_v32  ;;  %v1251_v21 = vrot.slane %v3182_v31, %v3545_v61 }
 0x174   :  { %v1484_v34 = vadd.f32 %v1476_v6, %v1432_v48  ;;  %v1381_v46 = vadd.f32 %v1373_v62, %v1329_v13  ;;  %v1278_v47 = vadd.f32 %v1270_v54, %v1226_v41  ;;  %v3208_v39 = vadd.f32 %v2307_v3, %v2306_v24 }
 0x175   :  { %v2310_v55 = vpop.f32.mrf.mxu0  ;;  %v1123_v42 = vmul.f32 %v1103_v16, %v3129_v25  ;;  %v1374_v60 = vmul.f32 %v1351_v43, %v3140_v8  ;;  %v1426_v26 = vmul.f32 %v1403_v58, %v3147_v19  ;;  %v1167_v45 = vmul.f32 %v1147_v20, %v3125_v63 }
 0x176   :  { %v1496_v44 = vadd.f32 %v3191_v29, %v1484_v34  ;;  %v1433_v18 = vadd.f32 %v1425_v14, %v1381_v46  ;;  %v1330_v22 = vadd.f32 %v1322_v15, %v1278_v47  ;;  %v1478_v23 = vmul.f32 %v1455_v4, %v3164_v40 }
 0x177   :  { %v1303_v52 = vrot.slane %v3182_v31, %v3546_v2  ;;  %v1175_v53 = vadd.f32 %v1167_v45, %v1123_v42  ;;  %v1219_v24 = vmul.f32 %v1199_v17, %v3127_v35  ;;  %v1271_v6 = vmul.f32 %v1251_v21, %v3133_v10 }
 0x178   :  { %v1504_v49 = vmax.f32 %v1496_v44, 0.0  ;;  %v1485_v37 = vadd.f32 %v1477_v0, %v1433_v18  ;;  %v1382_v50 = vadd.f32 %v1374_v60, %v1330_v22  ;;  %v1355_v33 = vrot.slane %v3182_v31, %v3547_v5 }
 0x179   :  { %v2312_v59 = vpop.f32.mrf.mxu0  ;;  %v1107_v11 = vrot.slane %v3208_v39, %v3542_v27  ;;  %v1227_v3 = vadd.f32 %v1219_v24, %v1175_v53  ;;  %v1407_v14 = vrot.slane %v3182_v31, %v3548_v56  ;;  %v1459_v9 = vrot.slane %v3182_v31, %v3549_v57 }
 0x17a   :  { %v1513_v7 = vsel %vm1512_vm0, %v1504_v49, 0.0  ;;  %v1497_v51 = vadd.f32 %v3191_v29, %v1485_v37  ;;  %v1434_v62 = vadd.f32 %v1426_v26, %v1382_v50  ;;  %v1323_v38 = vmul.f32 %v1303_v52, %v3131_v1 }
 0x17b   :  { %v2313_v30 = vpop.f32.mrf.mxu0  ;;  %1514 = vadd.xlane.f32.xlu0 %v1513_v7  ;;  %v1124_v48 = vmul.f32 %v1107_v11, %v3129_v25  ;;  %v1151_v13 = vrot.slane %v3208_v39, %v3543_v28  ;;  %v1279_v41 = vadd.f32 %v1271_v6, %v1227_v3  ;;  %v1203_v43 = vrot.slane %v3208_v39, %v3544_v32 }
 0x17c   :  { %v1505_v12 = vmax.f32 %v1497_v51, 0.0  ;;  %v1486_v54 = vadd.f32 %v1478_v23, %v1434_v62  ;;  %v1255_v58 = vrot.slane %v3208_v39, %v3545_v61  ;;  %v3238_v4 = vadd.f32 %v2310_v55, %v2309_v36 }
 0x17d   :  { %v2315_v0 = vpop.f32.mrf.mxu0  ;;  %v1375_v34 = vmul.f32 %v1355_v33, %v3140_v8  ;;  %v1168_v46 = vmul.f32 %v1151_v13, %v3125_v63  ;;  %v1331_v20 = vadd.f32 %v1323_v38, %v1279_v41  ;;  %v1427_v47 = vmul.f32 %v1407_v14, %v3147_v19 }
 0x17e   :  { %v1516_v31 = vsel %vm1512_vm0, %v1505_v12, 0.0  ;;  %v1498_v16 = vadd.f32 %v3191_v29, %v1486_v54  ;;  %v1479_v15 = vmul.f32 %v1459_v9, %v3164_v40  ;;  %v3246_v17 = vadd.f32 %v2313_v30, %v2312_v59 }
 0x17f   :  { %1517 = vadd.xlane.f32.xlu1 %v1516_v31  ;;  %v2316_v21 = vpop.f32.mrf.mxu0  ;;  %v1176_v44 = vadd.f32 %v1168_v46, %v1124_v48  ;;  %v1220_v36 = vmul.f32 %v1203_v43, %v3127_v35  ;;  %v1307_v55 = vrot.slane %v3208_v39, %v3546_v2  ;;  %v1383_v42 = vadd.f32 %v1375_v34, %v1331_v20 }
 0x180   :  { %v1506_v18 = vmax.f32 %v1498_v16, 0.0  ;;  %v1272_v22 = vmul.f32 %v1255_v58, %v3133_v10  ;;  %v1359_v60 = vrot.slane %v3208_v39, %v3547_v5  ;;  %v1111_v45 = vrot.slane %v3238_v4, %v3542_v27 }
 0x181   :  { %v1228_v26 = vadd.f32 %v1220_v36, %v1176_v44  ;;  %v1155_v49 = vrot.slane %v3238_v4, %v3543_v28  ;;  %v1207_v37 = vrot.slane %v3238_v4, %v3544_v32  ;;  %v3260_v23 = vadd.f32 %v2316_v21, %v2315_v0 }
 0x182   :  { %v1519_v52 = vsel %vm1512_vm0, %v1506_v18, 0.0  ;;  %v1435_v59 = vadd.f32 %v1427_v47, %v1383_v42  ;;  %v1411_v50 = vrot.slane %v3208_v39, %v3548_v56  ;;  %v1324_v24 = vmul.f32 %v1307_v55, %v3131_v1 }
 0x183   :  { %1520 = vadd.xlane.f32.xlu0 %v1519_v52  ;;  %v1280_v53 = vadd.f32 %v1272_v22, %v1228_v26  ;;  %v1125_v6 = vmul.f32 %v1111_v45, %v3129_v25  ;;  %v1169_v7 = vmul.f32 %v1155_v49, %v3125_v63  ;;  %v1376_v33 = vmul.f32 %v1359_v60, %v3140_v8 }
 0x184   :  { %v1487_v51 = vadd.f32 %v1479_v15, %v1435_v59  ;;  %v1463_v11 = vrot.slane %v3208_v39, %v3549_v57  ;;  %v1259_v30 = vrot.slane %v3238_v4, %v3545_v61  ;;  %v1221_v14 = vmul.f32 %v1207_v37, %v3127_v35 }
 0x185   :  { %v1332_v62 = vadd.f32 %v1324_v24, %v1280_v53  ;;  %v1177_v3 = vadd.f32 %v1169_v7, %v1125_v6  ;;  %v1311_v9 = vrot.slane %v3238_v4, %v3546_v2  ;;  %v1428_v38 = vmul.f32 %v1411_v50, %v3147_v19 }
 0x186   :  { %v1499_v12 = vadd.f32 %v3191_v29, %v1487_v51  ;;  %v1363_v48 = vrot.slane %v3238_v4, %v3547_v5  ;;  %v1415_v39 = vrot.slane %v3238_v4, %v3548_v56  ;;  %v1273_v54 = vmul.f32 %v1259_v30, %v3133_v10 }
 0x187   :  { %v1384_v13 = vadd.f32 %v1376_v33, %v1332_v62  ;;  %v1229_v0 = vadd.f32 %v1221_v14, %v1177_v3  ;;  %v1467_v41 = vrot.slane %v3238_v4, %v3549_v57  ;;  %v1115_v58 = vrot.slane %v3246_v17, %v3542_v27 }
 0x188   :  { %v1507_v43 = vmax.f32 %v1499_v12, 0.0  ;;  %v1159_v31 = vrot.slane %v3246_v17, %v3543_v28  ;;  %v1211_v34 = vrot.slane %v3246_v17, %v3544_v32  ;;  %v1480_v16 = vmul.f32 %v1463_v11, %v3164_v40 }
 0x189   :  { %v1436_v46 = vadd.f32 %v1428_v38, %v1384_v13  ;;  %v1281_v20 = vadd.f32 %v1273_v54, %v1229_v0  ;;  %v1325_v47 = vmul.f32 %v1311_v9, %v3131_v1  ;;  %v1126_v4 = vmul.f32 %v1115_v58, %v3129_v25 }
 0x18a   :  { %v1522_v15 = vsel %vm1512_vm0, %v1507_v43, 0.0  ;;  %v1170_v21 = vmul.f32 %v1159_v31, %v3125_v63  ;;  %v1263_v44 = vrot.slane %v3246_v17, %v3545_v61  ;;  %v1377_v18 = vmul.f32 %v1363_v48, %v3140_v8 }
 0x18b   :  { %1523 = vadd.xlane.f32.xlu0 %v1522_v15  ;;  %v1488_v36 = vadd.f32 %v1480_v16, %v1436_v46  ;;  %v1333_v55 = vadd.f32 %v1325_v47, %v1281_v20  ;;  %v1429_v42 = vmul.f32 %v1415_v39, %v3147_v19  ;;  %v1481_v22 = vmul.f32 %v1467_v41, %v3164_v40 }
 0x18c   :  { %v1178_v60 = vadd.f32 %v1170_v21, %v1126_v4  ;;  %v1222_v26 = vmul.f32 %v1211_v34, %v3127_v35  ;;  %v1315_v45 = vrot.slane %v3246_v17, %v3546_v2  ;;  %v1119_v52 = vrot.slane %v3260_v23, %v3542_v27 }
 0x18d   :  { %v1500_v49 = vadd.f32 %v3191_v29, %v1488_v36  ;;  %v1385_v37 = vadd.f32 %v1377_v18, %v1333_v55  ;;  %v1163_v59 = vrot.slane %v3260_v23, %v3543_v28  ;;  %v1274_v53 = vmul.f32 %v1263_v44, %v3133_v10 }
 0x18e   :  { %v1230_v50 = vadd.f32 %v1222_v26, %v1178_v60  ;;  %v1367_v24 = vrot.slane %v3246_v17, %v3547_v5  ;;  %v1419_v6 = vrot.slane %v3246_v17, %v3548_v56  ;;  %v1127_v33 = vmul.f32 %v1119_v52, %v3129_v25 }
 0x18f   :  { %v1508_v7 = vmax.f32 %v1500_v49, 0.0  ;;  %v1437_v51 = vadd.f32 %v1429_v42, %v1385_v37  ;;  %v1171_v11 = vmul.f32 %v1163_v59, %v3125_v63  ;;  %v1326_v62 = vmul.f32 %v1315_v45, %v3131_v1  ;;  %v3551_v59 = vld [vmem:[#allocation5_spill] sm:$0xff] }
 0x190   :  { %v1282_v30 = vadd.f32 %v1274_v53, %v1230_v50  ;;  %v1215_v3 = vrot.slane %v3260_v23, %v3544_v32  ;;  %v1267_v14 = vrot.slane %v3260_v23, %v3545_v61  ;;  %v1471_v38 = vrot.slane %v3246_v17, %v3549_v57 }
 0x191   :  { %v1525_v9 = vsel %vm1512_vm0, %v1508_v7, 0.0  ;;  %v1489_v12 = vadd.f32 %v1481_v22, %v1437_v51  ;;  %v1179_v48 = vadd.f32 %v1171_v11, %v1127_v33  ;;  %v1378_v63 = vmul.f32 %v1367_v24, %v3140_v8 }
 0x192   :  { %1526 = vadd.xlane.f32.xlu1 %v1525_v9  ;;  %v1334_v25 = vadd.f32 %v1326_v62, %v1282_v30  ;;  %v1223_v39 = vmul.f32 %v1215_v3, %v3127_v35  ;;  %v1319_v13 = vrot.slane %v3260_v23, %v3546_v2  ;;  %v1430_v61 = vmul.f32 %v1419_v6, %v3147_v19 }
 0x193   :  { %v1501_v32 = vadd.f32 %v3191_v29, %v1489_v12  ;;  %v1275_v41 = vmul.f32 %v1267_v14, %v3133_v10  ;;  %v1371_v17 = vrot.slane %v3260_v23, %v3547_v5  ;;  %v1482_v58 = vmul.f32 %v1471_v38, %v3164_v40 }
 0x194   :  { %v1386_v0 = vadd.f32 %v1378_v63, %v1334_v25  ;;  %v1231_v54 = vadd.f32 %v1223_v39, %v1179_v48  ;;  %v1327_v35 = vmul.f32 %v1319_v13, %v3131_v1  ;;  %v1423_v2 = vrot.slane %v3260_v23, %v3548_v56 }
 0x195   :  { %v1509_v43 = vmax.f32 %v1501_v32, 0.0  ;;  %v1379_v10 = vmul.f32 %v1371_v17, %v3140_v8  ;;  %v1475_v5 = vrot.slane %v3260_v23, %v3549_v57  ;;  %v2508_v57 = vld [vmem:[%s3476_s1] sm:$0xff]  ;;  %v3550_v60 = vlaneseq }
 0x196   :  { %v1438_v31 = vadd.f32 %v1430_v61, %v1386_v0  ;;  %v1283_v34 = vadd.f32 %v1275_v41, %v1231_v54  ;;  %v1431_v4 = vmul.f32 %v1423_v2, %v3147_v19  ;;  %v2549_v19 = vmov 0.0   ;;  %v41_v41 = vld [vmem:[%s3476_s1 + $0x28] sm:$0xff] }
 0x197   :  { %v1528_v46 = vsel %vm1512_vm0, %v1509_v43, 0.0  ;;  %v1483_v44 = vmul.f32 %v1475_v5, %v3164_v40  ;;  %2377 = vmatprep.subr.mxu1 %v2549_v19  ;;  %2379 = vmatprep.mubr.msk.f32.mxu1 %vm2550_vm1, %v2549_v19  ;;  %v2253_v40 = vld [vmem:[%s3476_s1 + $0x8] ss:$0 sm:$0xff]  ;;  %v1558_v26 = vand.u32 127, %v3550_v60  ;;  %v40_v43 = vld [vmem:[%s3476_s1 + $0x20] sm:$0xff]  ;;  %v53_v60 = vld [vmem:[#allocation2 + $0x58] sm:$0xff] }
 0x198   :  { %1529 = vadd.xlane.f32.xlu0 %v1528_v46  ;;  %v1490_v16 = vadd.f32 %v1482_v58, %v1438_v31  ;;  %v1335_v20 = vadd.f32 %v1327_v35, %v1283_v34  ;;  %v39_v58 = vld [vmem:[%s3476_s1 + $0x18] sm:$0xff]  ;;  %v38_v31 = vld [vmem:[%s3476_s1 + $0x10] sm:$0xff]  ;;  %v71_v5 = vld [vmem:[#allocation2 + $0xe8] sm:$0xff] }
 0x199   :  { %v1561_v50 = vsub.s32 %v1558_v26, %v3551_v59  ;;  %v73_v34 = vld [vmem:[#allocation2 + $0xf8] sm:$0xff]  ;;  %v52_v26 = vld [vmem:[#allocation2 + $0x50] sm:$0xff]  ;;  %v47_v59 = vld [vmem:[#allocation2 + $0x28] sm:$0xff] }
 0x19a   :  { %v1502_v47 = vadd.f32 %v3191_v29, %v1490_v16  ;;  %v1387_v15 = vadd.f32 %v1379_v10, %v1335_v20  ;;  %v72_v10 = vld [vmem:[#allocation2 + $0xf0] sm:$0xff] }
 0x19c   :  { %v1510_v21 = vmax.f32 %v1502_v47, 0.0  ;;  %v1439_v1 = vadd.f32 %v1431_v4, %v1387_v15  ;;  %v70_v47 = vld [vmem:[#allocation2 + $0xe0] sm:$0xff]  ;;  %v69_v15 = vld [vmem:[#allocation2 + $0xd8] sm:$0xff]  ;;  %v68_v4 = vld [vmem:[#allocation2 + $0xd0] sm:$0xff] }
 0x19e   :  { %v1531_v56 = vsel %vm1512_vm0, %v1510_v21, 0.0  ;;  %v1491_v36 = vadd.f32 %v1483_v44, %v1439_v1  ;;  %v67_v21 = vld [vmem:[#allocation2 + $0xc8] sm:$0xff]  ;;  %v66_v1 = vld [vmem:[#allocation2 + $0xc0] sm:$0xff]  ;;  %v65_v44 = vld [vmem:[#allocation2 + $0xb8] sm:$0xff] }
 0x19f   :  { %1532 = vadd.xlane.f32.xlu1 %v1531_v56  ;;  %v64_v56 = vld [vmem:[#allocation2 + $0xb0] sm:$0xff] }
 0x1a0   :  { %v1503_v55 = vadd.f32 %v3191_v29, %v1491_v36  ;;  %v63_v36 = vld [vmem:[#allocation2 + $0xa8] sm:$0xff] }
 0x1a2   :  { %v1511_v18 = vmax.f32 %v1503_v55, 0.0  ;;  %v62_v55 = vld [vmem:[#allocation2 + $0xa0] sm:$0xff] }
 0x1a4   :  { %v1534_v8 = vsel %vm1512_vm0, %v1511_v18, 0.0  ;;  %v61_v18 = vld [vmem:[#allocation2 + $0x98] sm:$0xff] }
 0x1a5   :  { %1535 = vadd.xlane.f32.xlu0 %v1534_v8  ;;  %v60_v8 = vld [vmem:[#allocation2 + $0x90] sm:$0xff] }
 0x1b0   :  { %1605 = vrot.lane.b32.xlu1 %v2508_v57, %s2548_s23  ;;  %v59_v57 = vld [vmem:[#allocation2 + $0x88] sm:$0xff] }
 0x1bb   :  { %1609 = vrot.lane.b32.xlu0 %v2253_v40, %s2548_s23  ;;  %v58_v40 = vld [vmem:[#allocation2 + $0x80] sm:$0xff] }
 0x204   :  { %v1515_v29 = vpop.xlane.xlu0 %1514 }
 0x205   :  { %v1537_v53 = vmul.f32 0.015625, %v1515_v29  ;;  %v57_v29 = vld [vmem:[#allocation2 + $0x78] sm:$0xff] }
 0x207   :  { %v1562_v62 = vrot.slane %v1537_v53, %v1561_v50  ;;  %v45_v53 = vld [vmem:[#allocation2 + $0x18] sm:$0xff] }
 0x208   :  { %v1518_v42 = vpop.xlane.xlu1 %1517 }
 0x209   :  { %v1538_v49 = vmul.f32 0.015625, %v1518_v42  ;;  %v55_v42 = vld [vmem:[#allocation2 + $0x68] sm:$0xff] }
 0x20b   :  { %v1566_v51 = vrot.slane %v1538_v49, %v1561_v50  ;;  %v50_v49 = vld [vmem:[#allocation2 + $0x40] sm:$0xff] }
 0x20c   :  { %v1521_v23 = vpop.xlane.xlu0 %1520 }
 0x20d   :  { %v1539_v37 = vmul.f32 0.015625, %v1521_v23  ;;  %v1592_v12 = vsel %vm1591_vm2, %v1566_v51, %v1562_v62  ;;  %v56_v23 = vld [vmem:[#allocation2 + $0x70] sm:$0xff] }
 0x20e   :  { %v105_v51 = vld [vmem:[#allocation2 + $0x2f0] sm:$0xff] }
 0x20f   :  { %v1570_v11 = vrot.slane %v1539_v37, %v1561_v50  ;;  %v49_v37 = vld [vmem:[#allocation2 + $0x38] sm:$0xff]  ;;  %2325 = vmatprep.subr.mxu0 %v105_v51  ;;  %v103_v62 = vld [vmem:[#allocation2 + $0x2d0] sm:$0xff]  ;;  %v124_v51 = vld [vmem:[#allocation2 + $0x401] ss:$0 sm:$0xff] }
 0x211   :  { %v1594_v48 = vsel %vm1593_vm3, %v1570_v11, %v1592_v12  ;;  %v104_v11 = vld [vmem:[#allocation2 + $0x2e0] sm:$0xff]  ;;  %v101_v12 = vld [vmem:[#allocation2 + $0x2b0] sm:$0xff] }
 0x214   :  { %v1524_v22 = vpop.xlane.xlu0 %1523 }
 0x215   :  { %v1540_v24 = vmul.f32 0.015625, %v1524_v22  ;;  %v54_v22 = vld [vmem:[#allocation2 + $0x60] sm:$0xff] }
 0x217   :  { %v1574_v3 = vrot.slane %v1540_v24, %v1561_v50  ;;  %v44_v24 = vld [vmem:[#allocation2 + $0x10] sm:$0xff] }
 0x219   :  { %v1596_v39 = vsel %vm1595_vm4, %v1574_v3, %v1594_v48  ;;  %v87_v3 = vld [vmem:[#allocation2 + $0x1d0] sm:$0xff]  ;;  %v100_v48 = vld [vmem:[#allocation2 + $0x2a0] sm:$0xff] }
 0x21b   :  { %v1527_v45 = vpop.xlane.xlu1 %1526 }
 0x21c   :  { %v1541_v6 = vmul.f32 0.015625, %v1527_v45  ;;  %v51_v45 = vld [vmem:[#allocation2 + $0x48] sm:$0xff] }
 0x21e   :  { %v1578_v14 = vrot.slane %v1541_v6, %v1561_v50  ;;  %v43_v6 = vld [vmem:[#allocation2 + $0x8] sm:$0xff] }
 0x220   :  { %v1598_v32 = vsel %vm1597_vm5, %v1578_v14, %v1596_v39  ;;  %v102_v14 = vld [vmem:[#allocation2 + $0x2c0] sm:$0xff]  ;;  %v83_v39 = vld [vmem:[#allocation2 + $0x190] sm:$0xff] }
 0x221   :  { %v1530_v52 = vpop.xlane.xlu0 %1529 }
 0x222   :  { %v1542_v33 = vmul.f32 0.015625, %v1530_v52  ;;  %v48_v52 = vld [vmem:[#allocation2 + $0x30] sm:$0xff] }
 0x224   :  { %v1582_v38 = vrot.slane %v1542_v33, %v1561_v50  ;;  %v89_v33 = vld [vmem:[#allocation2 + $0x1f0] sm:$0xff] }
 0x225   :  { %2326 = vmatpush3.msra.mxu0 %v89_v33 }
 0x226   :  { %v1600_v61 = vsel %vm1599_vm6, %v1582_v38, %v1598_v32  ;;  %2327 = vmatprep.subr.mxu0 %v104_v11  ;;  %v85_v38 = vld [vmem:[#allocation2 + $0x1b0] sm:$0xff]  ;;  %v82_v32 = vld [vmem:[#allocation2 + $0x180] sm:$0xff] }
 0x228   :  { %v1533_v7 = vpop.xlane.xlu1 %1532 }
 0x229   :  { %v1543_v30 = vmul.f32 0.015625, %v1533_v7  ;;  %v42_v7 = vld [vmem:[#allocation2] sm:$0xff] }
 0x22b   :  { %v1586_v25 = vrot.slane %v1543_v30, %v1561_v50  ;;  %v88_v30 = vld [vmem:[#allocation2 + $0x1e0] sm:$0xff] }
 0x22c   :  { %v1606_v9 = vpop.permute.xlu1 %1605  ;;  %2328 = vmatpush3.msra.mxu0 %v88_v30 }
 0x22d   :  { %2378 = vmatpush3.msra.mxu1 %v1606_v9  ;;  %v1602_v54 = vsel %vm1601_vm7, %v1586_v25, %v1600_v61  ;;  %2329 = vmatprep.subr.mxu0 %v103_v62  ;;  %v86_v9 = vld [vmem:[#allocation2 + $0x1c0] sm:$0xff]  ;;  %v97_v61 = vld [vmem:[#allocation2 + $0x270] sm:$0xff] }
 0x22e   :  { %v1536_v63 = vpop.xlane.xlu0 %1535  ;;  %2382 = vmatprep.subr.mxu1 %v2549_v19  ;;  %2330 = vmatpush3.msra.mxu0 %v87_v3  ;;  %v84_v25 = vld [vmem:[#allocation2 + $0x1a0] sm:$0xff] }
 0x22f   :  { %v1544_v13 = vmul.f32 0.015625, %v1536_v63  ;;  %2331 = vmatprep.subr.mxu0 %v102_v14  ;;  %v99_v63 = vld [vmem:[#allocation2 + $0x290] sm:$0xff]  ;;  %v2479_v3 = vld [vmem:[%s3479_s4 + $0x60] ss:$24 sps:$4 sm:$0xff]   ;;  %v2481_v14 = vld [vmem:[%s3479_s4 + $0x64] ss:$24 sps:$4 sm:$0xff]  }
 0x230   :  { %2332 = vmatpush3.msra.mxu0 %v86_v9  ;;  %v2484_v9 = vld [vmem:[%s3479_s4 + $0x6c] ss:$24 sps:$4 sm:$0xff]  }
 0x231   :  { %v1590_v0 = vrot.slane %v1544_v13, %v1561_v50  ;;  %v46_v50 = vld [vmem:[#allocation2 + $0x20] sm:$0xff]  ;;  %2333 = vmatprep.subr.mxu0 %v101_v12  ;;  %v2487_v12 = vld [vmem:[%s3479_s4 + $0x34] ss:$24 sps:$4 sm:$0xff]  }
 0x232   :  { %v1610_v35 = vpop.permute.xlu0 %1609  ;;  %2334 = vmatpush3.msra.mxu0 %v85_v38  ;;  %v98_v13 = vld [vmem:[#allocation2 + $0x280] sm:$0xff]  ;;  %v2490_v38 = vld [vmem:[%s3479_s4 + $0x3c] ss:$24 sps:$4 sm:$0xff]  }
 0x233   :  { %v1604_v17 = vsel %vm1603_vm8, %v1590_v0, %v1602_v54  ;;  %2335 = vmatprep.subr.mxu0 %v100_v48  ;;  %v81_v0 = vld [vmem:[#allocation2 + $0x170] sm:$0xff]  ;;  %v96_v54 = vld [vmem:[#allocation2 + $0x260] sm:$0xff] }
 0x234   :  { %2380 = vmatmul.mubr.msk.f32.vlgmr.msra.gmra.mxu1 %vm1612_vm9, %v1604_v17  ;;  %2336 = vmatpush3.msra.mxu0 %v84_v25  ;;  %v95_v17 = vld [vmem:[#allocation2 + $0x250] sm:$0xff] }
 0x235   :  { %2383 = vmatpush3.msra.mxu1 %v41_v41  ;;  %2390 = vmatprep.mubr.msk.f32.mxu1 %vm2550_vm1, %v2549_v19  ;;  %v80_v41 = vld [vmem:[#allocation2 + $0x160] sm:$0xff]  ;;  %v2485_v48 = vld [vmem:[%s3479_s4 + $0x30] ss:$24 sps:$4 sm:$0xff]  }
 0x236   :  { %2384 = vmatprep.subr.mxu1 %v2549_v19  ;;  %2337 = vmatprep.subr.mxu0 %v99_v63  ;;  %v2488_v25 = vld [vmem:[%s3479_s4 + $0x38] ss:$24 sps:$4 sm:$0xff]   ;;  %v2493_v63 = vld [vmem:[%s3479_s4 + $0x4] ss:$24 sps:$4 sm:$0xff]  }
 0x237   :  { %2385 = vmatpush3.msra.mxu1 %v40_v43  ;;  %2338 = vmatpush3.msra.mxu0 %v83_v39  ;;  %v79_v43 = vld [vmem:[#allocation2 + $0x150] sm:$0xff]  ;;  %v2496_v39 = vld [vmem:[%s3479_s4 + $0xc] ss:$24 sps:$4 sm:$0xff]  }
 0x238   :  { %2386 = vmatprep.subr.mxu1 %v2549_v19  ;;  %2339 = vmatprep.subr.mxu0 %v98_v13  ;;  %v2491_v13 = vld [vmem:[%s3479_s4] ss:$24 sps:$4 sm:$0xff]  }
 0x239   :  { %2387 = vmatpush3.msra.mxu1 %v39_v58  ;;  %2340 = vmatpush3.msra.mxu0 %v82_v32  ;;  %v94_v58 = vld [vmem:[#allocation2 + $0x240] sm:$0xff] }
 0x23a   :  { %2388 = vmatprep.subr.mxu1 %v2549_v19  ;;  %2341 = vmatprep.subr.mxu0 %v97_v61  ;;  %v2494_v32 = vld [vmem:[%s3479_s4 + $0x8] ss:$24 sps:$4 sm:$0xff]   ;;  %v2499_v61 = vld [vmem:[%s3479_s4 + $0x74] ss:$24 sps:$4 sm:$0xff]  }
 0x23b   :  { %2389 = vmatpush3.msra.mxu1 %v38_v31  ;;  %2342 = vmatpush3.msra.mxu0 %v81_v0  ;;  %v78_v31 = vld [vmem:[#allocation2 + $0x140] sm:$0xff] }
 0x23c   :  { %1775 = vmatprep.subr.mxu1 %v73_v34  ;;  %2343 = vmatprep.subr.mxu0 %v96_v54  ;;  %v93_v34 = vld [vmem:[#allocation2 + $0x230] sm:$0xff]  ;;  %v125_v0 = vld [vmem:[#allocation2 + $0x402] ss:$0 sm:$0xff] }
 0x23d   :  { %2344 = vmatpush3.msra.mxu0 %v80_v41 }
 0x23e   :  { %2345 = vmatprep.subr.mxu0 %v95_v17 }
 0x23f   :  { %2346 = vmatpush3.msra.mxu0 %v79_v43 }
 0x240   :  { %2347 = vmatprep.subr.mxu0 %v94_v58  ;;  %v2497_v58 = vld [vmem:[%s3479_s4 + $0x70] ss:$24 sps:$4 sm:$0xff]  }
 0x241   :  { %2348 = vmatpush3.msra.mxu0 %v78_v31 }
 0x242   :  { %2349 = vmatprep.subr.mxu0 %v93_v34  ;;  %v2502_v34 = vld [vmem:[%s3479_s4 + $0x44] ss:$24 sps:$4 sm:$0xff]  }
 0x2f4   :  { %v1681_v2 = vpop.f32.mrf.mxu1 }
 0x2f5   :  { %v1682_v46 = vadd.f32 %v1681_v2, %v1610_v35  ;;  %v2255_v35 = vld [vmem:[%s3476_s1 + $0x9] ss:$0 sm:$0xff] }
 0x2f6   :  { %v2381_v16 = vpop.f32.mrf.mxu1 }
 0x2f7   :  { %v1685_v20 = vmax.f32 %v1682_v46, 0.0 }
 0x2f9   :  { %2391 = vmatmul.mubr.msk.f32.vlgmr.msra.gmra.mxu1 %vm1690_vm10, %v1685_v20  ;;  %v77_v20 = vld [vmem:[#allocation2 + $0x130] sm:$0xff] }
 0x2fa   :  { %1776 = vmatpush1.msra.mxu1 %v72_v10  ;;  %1839 = vmatprep.mubr.f32.mxu1 %v2549_v19  ;;  %v92_v10 = vld [vmem:[#allocation2 + $0x220] sm:$0xff] }
 0x2fb   :  { %1777 = vmatprep.subr.mxu1 %v71_v5  ;;  %2350 = vmatpush3.msra.mxu0 %v77_v20  ;;  %v76_v5 = vld [vmem:[#allocation2 + $0x120] sm:$0xff] }
 0x2fc   :  { %1778 = vmatpush1.msra.mxu1 %v70_v47  ;;  %2351 = vmatprep.subr.mxu0 %v92_v10  ;;  %v91_v47 = vld [vmem:[#allocation2 + $0x210] sm:$0xff] }
 0x2fd   :  { %1779 = vmatprep.subr.mxu1 %v69_v15  ;;  %v75_v15 = vld [vmem:[#allocation2 + $0x110] sm:$0xff]  ;;  %2352 = vmatpush3.msra.mxu0 %v76_v5 }
 0x2fe   :  { %1780 = vmatpush1.msra.mxu1 %v68_v4  ;;  %v90_v4 = vld [vmem:[#allocation2 + $0x200] sm:$0xff]  ;;  %2353 = vmatprep.subr.mxu0 %v91_v47 }
 0x2ff   :  { %1781 = vmatprep.subr.mxu1 %v67_v21  ;;  %v74_v21 = vld [vmem:[#allocation2 + $0x100] sm:$0xff]  ;;  %2354 = vmatpush3.msra.mxu0 %v75_v15 }
 0x300   :  { %1782 = vmatpush1.msra.mxu1 %v66_v1  ;;  %v121_v1 = vld [vmem:[#allocation2 + $0x3f0] sm:$0xff]  ;;  %2355 = vmatprep.subr.mxu0 %v90_v4 }
 0x301   :  { %1783 = vmatprep.subr.mxu1 %v65_v44  ;;  %v120_v44 = vld [vmem:[#allocation2 + $0x3e0] sm:$0xff]  ;;  %2356 = vmatpush3.msra.mxu0 %v74_v21 }
 0x302   :  { %1784 = vmatpush1.msra.mxu1 %v64_v56  ;;  %v119_v56 = vld [vmem:[#allocation2 + $0x3d0] sm:$0xff]  ;;  %2113 = vmatprep.subr.bf16.mxu0 %v2481_v14 }
 0x303   :  { %1785 = vmatprep.subr.mxu1 %v63_v36  ;;  %v118_v36 = vld [vmem:[#allocation2 + $0x3c0] sm:$0xff] }
 0x304   :  { %1786 = vmatpush1.msra.mxu1 %v62_v55  ;;  %v117_v55 = vld [vmem:[#allocation2 + $0x3b0] sm:$0xff] }
 0x305   :  { %1787 = vmatprep.subr.mxu1 %v61_v18  ;;  %v116_v18 = vld [vmem:[#allocation2 + $0x3a0] sm:$0xff] }
 0x306   :  { %1788 = vmatpush1.msra.mxu1 %v60_v8  ;;  %v115_v8 = vld [vmem:[#allocation2 + $0x390] sm:$0xff] }
 0x307   :  { %1789 = vmatprep.subr.mxu1 %v59_v57  ;;  %v114_v57 = vld [vmem:[#allocation2 + $0x380] sm:$0xff] }
 0x308   :  { %1790 = vmatpush1.msra.mxu1 %v58_v40  ;;  %v113_v40 = vld [vmem:[#allocation2 + $0x370] sm:$0xff] }
 0x309   :  { %1791 = vmatprep.subr.mxu1 %v57_v29  ;;  %v112_v29 = vld [vmem:[#allocation2 + $0x360] sm:$0xff] }
 0x30a   :  { %1792 = vmatpush1.msra.mxu1 %v56_v23  ;;  %v111_v23 = vld [vmem:[#allocation2 + $0x350] sm:$0xff] }
 0x30b   :  { %1793 = vmatprep.subr.mxu1 %v55_v42  ;;  %v123_v42 = vld [vmem:[#allocation2 + $0x400] ss:$8 sm:$0x3] }
 0x30c   :  { %1794 = vmatpush1.msra.mxu1 %v54_v22  ;;  %v1768_v22 = vrot.slane %v123_v42, %v3542_v27  ;;  %v107_v27 = vld [vmem:[#allocation2 + $0x310] sm:$0xff] }
 0x30d   :  { %1795 = vmatprep.subr.mxu1 %v53_v60  ;;  %v1772_v60 = vrot.slane %v123_v42, %v3543_v28  ;;  %v106_v28 = vld [vmem:[#allocation2 + $0x300] sm:$0xff] }
 0x30e   :  { %1796 = vmatpush1.msra.mxu1 %v52_v26 }
 0x30f   :  { %1797 = vmatprep.subr.mxu1 %v51_v45 }
 0x310   :  { %1798 = vmatpush1.msra.mxu1 %v50_v49 }
 0x311   :  { %1799 = vmatprep.subr.mxu1 %v49_v37 }
 0x312   :  { %1800 = vmatpush1.msra.mxu1 %v48_v52 }
 0x313   :  { %1801 = vmatprep.subr.mxu1 %v47_v59 }
 0x314   :  { %1802 = vmatpush1.msra.mxu1 %v46_v50  ;;  %v3552_v50 = vmov 0  }
 0x315   :  { %1803 = vmatprep.subr.mxu1 %v45_v53  ;;  %v110_v53 = vld [vmem:[#allocation2 + $0x340] sm:$0xff] }
 0x316   :  { %1804 = vmatpush1.msra.mxu1 %v44_v24  ;;  %v109_v24 = vld [vmem:[#allocation2 + $0x330] sm:$0xff] }
 0x317   :  { %1805 = vmatprep.subr.mxu1 %v43_v6  ;;  %v108_v6 = vld [vmem:[#allocation2 + $0x320] sm:$0xff] }
 0x318   :  { %1806 = vmatpush1.msra.mxu1 %v42_v7 }
 0x319   :  { %2393 = vmatprep.subr.mxu1 %v2549_v19 }
 0x3b9   :  { %v1760_v2 = vpop.f32.mrf.mxu1 }
 0x3ba   :  { %v1761_v46 = vadd.f32 %v2255_v35, %v1760_v2  ;;  %v2500_v35 = vld [vmem:[%s3479_s4 + $0x40] ss:$24 sps:$4 sm:$0xff]   ;;  %v2505_v2 = vld [vmem:[%s3479_s4 + $0x14] ss:$24 sps:$4 sm:$0xff]  }
 0x3bb   :  { %v2392_v16 = vpop.f32.mrf.mxu1 }
 0x3bc   :  { %1840 = vmatmul.mubr.f32.vlgmr.msra.gmra.mxu1 %v1761_v46  ;;  %v2503_v46 = vld [vmem:[%s3479_s4 + $0x10] ss:$24 sps:$4 sm:$0xff]  }
 0x3bd   :  { %2425 = vmatprep.mubr.msk.f32.mxu1 %vm2550_vm1, %v2549_v19  ;;  %2394 = vmatpush3.msra.mxu1 %v121_v1 }
 0x3be   :  { %2395 = vmatprep.subr.mxu1 %v2549_v19 }
 0x3bf   :  { %2396 = vmatpush3.msra.mxu1 %v120_v44 }
 0x3c0   :  { %2397 = vmatprep.subr.mxu1 %v2549_v19 }
 0x3c1   :  { %2398 = vmatpush3.msra.mxu1 %v119_v56 }
 0x3c2   :  { %2399 = vmatprep.subr.mxu1 %v2549_v19 }
 0x3c3   :  { %2400 = vmatpush3.msra.mxu1 %v118_v36 }
 0x3c4   :  { %2401 = vmatprep.subr.mxu1 %v2549_v19 }
 0x3c5   :  { %2402 = vmatpush3.msra.mxu1 %v117_v55 }
 0x3c6   :  { %2403 = vmatprep.subr.mxu1 %v2549_v19 }
 0x3c7   :  { %2404 = vmatpush3.msra.mxu1 %v116_v18 }
 0x3c8   :  { %2405 = vmatprep.subr.mxu1 %v2549_v19 }
 0x3c9   :  { %2406 = vmatpush3.msra.mxu1 %v115_v8 }
 0x3ca   :  { %2407 = vmatprep.subr.mxu1 %v2549_v19 }
 0x3cb   :  { %2408 = vmatpush3.msra.mxu1 %v114_v57 }
 0x3cc   :  { %2409 = vmatprep.subr.mxu1 %v2549_v19 }
 0x3cd   :  { %2410 = vmatpush3.msra.mxu1 %v113_v40 }
 0x3ce   :  { %2411 = vmatprep.subr.mxu1 %v2549_v19 }
 0x3cf   :  { %2412 = vmatpush3.msra.mxu1 %v112_v29 }
 0x3d0   :  { %2413 = vmatprep.subr.mxu1 %v2549_v19 }
 0x3d1   :  { %2414 = vmatpush3.msra.mxu1 %v111_v23 }
 0x3d2   :  { %2415 = vmatprep.subr.mxu1 %v2549_v19 }
 0x3d3   :  { %2416 = vmatpush3.msra.mxu1 %v110_v53 }
 0x3d4   :  { %2417 = vmatprep.subr.mxu1 %v2549_v19 }
 0x3d5   :  { %2418 = vmatpush3.msra.mxu1 %v109_v24 }
 0x3d6   :  { %2419 = vmatprep.subr.mxu1 %v2549_v19 }
 0x3d7   :  { %2420 = vmatpush3.msra.mxu1 %v108_v6 }
 0x3d8   :  { %2421 = vmatprep.subr.mxu1 %v2549_v19 }
 0x3d9   :  { %2422 = vmatpush3.msra.mxu1 %v107_v27 }
 0x3da   :  { %2423 = vmatprep.subr.mxu1 %v2549_v19  ;;  %v2482_v19 = vld [vmem:[%s3479_s4 + $0x68] ss:$24 sps:$4 sm:$0xff]  }
 0x3db   :  { %2424 = vmatpush3.msra.mxu1 %v106_v28 }
 0x3dc   :  { %2154 = vmatprep.subr.bf16.mxu1 %v2484_v9 }
 0x47c   :  { %v1841_v26 = vpop.f32.mrf.mxu1 }
 0x47d   :  { %v1842_v45 = vadd.f32 %v1841_v26, %v1768_v22 }
 0x47e   :  { %v1843_v49 = vpop.f32.mrf.mxu1 }
 0x47f   :  { %v1844_v37 = vadd.f32 %v1843_v49, %v1772_v60  ;;  %v1846_v59 = vmax.f32 %v1842_v45, 0.0 }
 0x481   :  { %v1847_v52 = vmax.f32 %v1844_v37, 0.0 }
 0x483   :  { %1912 = vmatprep.mubr.f32.mxu0 %v1847_v52 }
 0x484   :  { %1913 = vmatmul.mubr.f32.vlgmr.msra.gmra.mxu0 %v1846_v59 }
 0x485   :  { %2135 = vmatprep.mubr.bf16.mxu0 %v3552_v50  ;;  %2114 = vmatpush1.bf16.msra.mxu0 %v2479_v3 }
 0x486   :  { %2115 = vmatprep.subr.bf16.mxu0 %v2487_v12 }
 0x489   :  { %2116 = vmatpush1.bf16.msra.mxu0 %v2485_v48 }
 0x48a   :  { %2117 = vmatprep.subr.bf16.mxu0 %v2493_v63 }
 0x48d   :  { %2118 = vmatpush1.bf16.msra.mxu0 %v2491_v13 }
 0x48e   :  { %2195 = vmatprep.subr.bf16.mxu0 %v2499_v61 }
 0x544   :  { %v2357_v7 = vpop.f32.mrf.mxu0 }
 0x546   :  { %v2358_v33 = vpop.f32.mrf.mxu0 }
 0x547   :  { %v2359_v11 = vadd.f32 %v2358_v33, %v2357_v7 }
 0x549   :  { %v1915_v30 = vadd.f32 %v2359_v11, %v124_v51 }
 0x54b   :  { %v1918_v62 = vmax.f32 %v1915_v30, 0.0 }
 0x54d   :  { %2426 = vmatmul.mubr.f32.vlgmr.msra.gmra.mxu1 %v1918_v62 }
 0x54e   :  { %2176 = vmatprep.mubr.bf16.mxu1 %v3552_v50  ;;  %2155 = vmatpush1.bf16.msra.mxu1 %v2482_v19 }
 0x54f   :  { %2156 = vmatprep.subr.bf16.mxu1 %v2490_v38 }
 0x552   :  { %2157 = vmatpush1.bf16.msra.mxu1 %v2488_v25 }
 0x553   :  { %2158 = vmatprep.subr.bf16.mxu1 %v2496_v39 }
 0x556   :  { %2159 = vmatpush1.bf16.msra.mxu1 %v2494_v32 }
 0x60d   :  { %v1985_v54 = vpop.f32.mrf.mxu1 }
 0x60e   :  { %v1986_v41 = vadd.f32 %v1985_v54, %v125_v0 }
 0x60f   :  { %v2427_v17 = vpop.f32.mrf.mxu1 }
 0x610   :  { %2506 = vtanh.f32 %v1986_v41 }
 0x61d   :  { %v2507_v43 = vpop.eup %2506 }
 0x61e   :  { %v1990_v31 = vpack.c.bf16 %v2507_v43, %v2507_v43 }
 0x620   :  { %2275 = vmatmul.mubr.msk.bf16.vlgmr.msra.gmra.mxu0 %vm2099_vm11, %v1990_v31  ;;  %2276 = vmatmul.mubr.msk.bf16.vlgmr.msra.gmra.mxu1 %vm2099_vm11, %v1990_v31 }
 0x621   :  { %2196 = vmatpush1.bf16.msra.mxu0 %v2497_v58  ;;  %2217 = vmatprep.mubr.bf16.mxu0 %v3552_v50 }
 0x622   :  { %2197 = vmatprep.subr.bf16.mxu0 %v2502_v34 }
 0x625   :  { %2198 = vmatpush1.bf16.msra.mxu0 %v2500_v35 }
 0x626   :  { %2199 = vmatprep.subr.bf16.mxu0 %v2505_v2 }
 0x629   :  { %2200 = vmatpush1.bf16.msra.mxu0 %v2503_v46 }
 0x62c   :  { %2277 = vmatmul.mubr.msk.bf16.vlgmr.msra.gmra.mxu0 %vm2099_vm11, %v1990_v31 }
 0x6e0   :  { %v2137_v16 = vpop.f32.mrf.mxu0  ;;  %v2178_v20 = vpop.f32.mrf.mxu1 }
 0x6e1   :  { %2226 = vst [vmem:[%s3480_s5] sm:$0xff] %v2137_v16  ;;  %2228 = vst [vmem:[%s3480_s5 + $0x10] sm:$0xff] %v2178_v20 }
 0x6e2   :  { %v2139_v10 = vpop.f32.mrf.mxu0  ;;  %v2180_v5 = vpop.f32.mrf.mxu1 }
 0x6e3   :  { %2227 = vst [vmem:[%s3480_s5 + $0x8] sm:$0xff] %v2139_v10  ;;  %2229 = vst [vmem:[%s3480_s5 + $0x18] sm:$0xff] %v2180_v5 }
 0x6e4   :  { %v2141_v47 = vpop.f32.mrf.mxu0  ;;  %v2182_v15 = vpop.f32.mrf.mxu1 }
 0x6e6   :  { %v2142_v4 = vpop.f32.mrf.mxu0  ;;  %v2183_v21 = vpop.f32.mrf.mxu1 }
 0x6ec   :  { %v2219_v1 = vpop.f32.mrf.mxu0 }
 0x6ed   :  { %2230 = vst [vmem:[%s3480_s5 + $0x20] sm:$0xff] %v2219_v1 }
 0x6ee   :  { %v2221_v44 = vpop.f32.mrf.mxu0 }
 0x6ef   :  { %2231 = vst [vmem:[%s3480_s5 + $0x28] sm:$0xff] %v2221_v44 }
 0x6f0   :  { %v2223_v56 = vpop.f32.mrf.mxu0 }
 0x6f2   :  { %v2224_v36 = vpop.f32.mrf.mxu0 }
 0x6f3   :  { %2236 = vsyncpa [#allocation3], 1 }

</bundles_post_ra>
